<compile_context>
chip_gen: v7x
topology: tpu7x:2x2x1
jax: 0.10.0
libtpu: 0.0.40
codegen_flags: <defaults>
</compile_context>

<pallas_src>
import math
import numpy as np
import jax
import jax.numpy as jnp
from jax.experimental import pallas as pl
from jax.experimental.pallas import tpu as pltpu


def ssm_kernel(x_ref, w_ref, b_ref, a_t_ref, dvec_ref,
               y_ref, hout_ref, h_scratch):
    """One grid step = one chunk of T timesteps.

    x_ref:    (B, T, D)       input chunk
    w_ref:    (D, 2N+D)       fused projection weight, columns [B | C | dt]
    b_ref:    (1, 2N+D)       fused projection bias
    a_t_ref:  (N, D)          precomputed -exp(A_log).T  (loop invariant)
    dvec_ref: (1, D)          D skip vector
    y_ref:    (B, D)          y of the FINAL timestep (written on last chunk)
    hout_ref: (B, T, N, D)    hidden states of this chunk (lane axis = D)
    h_scratch:(B, N, D)       carried hidden state across chunks
    """
    i = pl.program_id(0)
    n_chunks = pl.num_programs(0)

    Bsz, T, D = x_ref.shape
    N = a_t_ref.shape[0]

    @pl.when(i == 0)
    def _():
        h_scratch[...] = jnp.zeros_like(h_scratch)

    x_chunk = x_ref[...]                                     # (B, T, D)
    x2 = x_chunk.reshape(Bsz * T, D)                         # (B*T, D)

    # Single fused GEMM for the whole chunk: B, C and (folded) dt columns.
    proj = jnp.dot(x2, w_ref[...],
                   preferred_element_type=jnp.float32) + b_ref[...]   # (B*T, 2N+D)
    Bm = proj[:, :N].reshape(Bsz, T, N)                      # (B, T, N)
    dt = proj[:, 2 * N:].reshape(Bsz, T, D)                  # (B, T, D)

    A_T = a_t_ref[...]                                       # (N, D) = -exp(A_log).T

    # Sequential recurrence over the chunk.  T is small and static, so this
    # Python loop is a fully-unrolled trace with static slice indices.
    h = h_scratch[...]                                       # (B, N, D)
    for t in range(T):
        dt_t = dt[:, t, :]                                   # (B, D)
        dA = dt_t[:, None, :] * A_T[None, :, :]              # (B, N, D)
        dB = dt_t[:, None, :] * Bm[:, t, :, None]            # (B, N, D)
        x_t = x_chunk[:, t, :]                               # (B, D)
        # TODO(synk): mask*h + detach(h)*(1-mask) straight-through trick is a
        # forward-pass identity and is omitted (grad-only effect).
        h = jnp.clip(h * dA + x_t[:, None, :] * dB, -1.0e6, 1.0e6)
        hout_ref[:, t, :, :] = h
    h_scratch[...] = h

    # Only the last timestep's y is returned by the module -> compute it once,
    # on the final chunk only (single cross-sublane reduce).
    @pl.when(i == n_chunks - 1)
    def _():
        c_last = proj[:, N:2 * N].reshape(Bsz, T, N)[:, T - 1, :]   # (B, N)
        y = (jnp.sum(h * c_last[:, :, None], axis=1)
             + dvec_ref[...] * x_chunk[:, T - 1, :])                # (B, D)
        y_ref[...] = y


def _choose_seq_chunk(S, B, D, N, max_chunk=8, budget_bytes=16 * 1024 * 1024):
    """Largest divisor of S (<= max_chunk) whose double-buffered blocks fit the
    VMEM budget; prefer multiples of 8 for sublane-aligned x blocks."""
    feas = []
    for T in range(1, min(S, max_chunk) + 1):
        if S % T != 0:
            continue
        est = 4 * (2 * B * T * D + 2 * B * T * N * D + B * N * D
                   + 2 * D * (2 * N + D))
        if est <= budget_bytes:
            feas.append(T)
    if not feas:
        return 1
    mult8 = [T for T in feas if T % 8 == 0]
    return max(mult8) if mult8 else max(feas)


def ssm_forward(x, params, max_chunk=8):
    """x: (B, S, D) float32.  Returns (y_last (B, D), hidden (B, S, D, N))."""
    Wx, bx, Wdt, bdt, A_log, Dvec = params
    Bsz, S, D = x.shape
    N = A_log.shape[1]
    R = Wdt.shape[1]
    NC = 2 * N + D                              # fused projection width

    # ---- Loop-invariant prep (plain JAX glue, done once per call) ----------
    wxT = jnp.asarray(Wx).T                     # (D, N+R+N), cols = [B | dt | C]
    W_B = wxT[:, :N]                            # (D, N)
    W_dtlow = wxT[:, N:N + R]                   # (D, R)
    W_C = wxT[:, N + R:]                        # (D, N)
    bx = jnp.asarray(bx)
    # Fold dt_proj into the projection: one GEMM instead of two in-kernel.
    W_dt = jnp.dot(W_dtlow, jnp.asarray(Wdt).T,
                   precision=jax.lax.Precision.HIGHEST)          # (D, D)
    b_dt = (jnp.dot(bx[N:N + R], jnp.asarray(Wdt).T,
                    precision=jax.lax.Precision.HIGHEST)
            + jnp.asarray(bdt))                                  # (D,)
    w_comb = jnp.concatenate([W_B, W_C, W_dt], axis=1)           # (D, 2N+D)
    b_comb = jnp.concatenate([bx[:N], bx[N + R:], b_dt]).reshape(1, NC)
    a_t = (-jnp.exp(jnp.asarray(A_log))).T                       # (N, D) hoisted
    dvec = jnp.asarray(Dvec).reshape(1, D)

    T = _choose_seq_chunk(S, Bsz, D, N, max_chunk=max_chunk)
    n_chunks = S // T
    const2 = lambda i: (0, 0)

    y, h_nd = pl.pallas_call(
        ssm_kernel,
        out_shape=(jax.ShapeDtypeStruct((Bsz, D), jnp.float32),
                   jax.ShapeDtypeStruct((Bsz, S, N, D), jnp.float32)),
        grid_spec=pltpu.PrefetchScalarGridSpec(
            num_scalar_prefetch=0,
            grid=(n_chunks,),
            in_specs=[
                pl.BlockSpec((Bsz, T, D), lambda i: (0, i, 0)),   # x chunk
                pl.BlockSpec((D, NC), const2),                    # fused W
                pl.BlockSpec((1, NC), const2),                    # fused bias
                pl.BlockSpec((N, D), const2),                     # -exp(A_log)^T
                pl.BlockSpec((1, D), const2),                     # D vec
            ],
            out_specs=(pl.BlockSpec((Bsz, D), lambda i: (0, 0)),
                       pl.BlockSpec((Bsz, T, N, D), lambda i: (0, i, 0, 0))),
            scratch_shapes=[pltpu.VMEM((Bsz, N, D), jnp.float32)],
        ),
        compiler_params=pltpu.CompilerParams(
            dimension_semantics=("arbitrary",),     # sequential recurrence
            # Safe on all generations (<= physical VMEM on v5e/v6e/v7x); at
            # production sizes re-derive T and this limit per generation.
            vmem_limit_bytes=32 * 1024 * 1024,
        ),
    )(x, w_comb, b_comb, a_t, dvec)

    # Kernel stores hidden as (B, S, N, D) (lane axis = D); module layout is
    # (B, S, D, N).  Wrapper-side transpose is layout plumbing only.
    hidden = jnp.transpose(h_nd, (0, 1, 3, 2))
    return y, hidden


def ssm_reference(x, params):
    """Pure numpy reference matching the PyTorch SSM.forward semantics."""
    Wx, bx, Wdt, bdt, A_log, Dvec = [np.asarray(p, np.float32) for p in params]
    x = np.asarray(x, np.float32)
    Bsz, S, D = x.shape
    N = A_log.shape[1]
    R = Wdt.shape[1]
    h = np.zeros((Bsz, D, N), np.float32)
    hs = []
    y = None
    for t in range(S):
        xt = x[:, t, :]
        xp = xt @ Wx.T + bx
        Bm, dtl, Cm = xp[:, :N], xp[:, N:N + R], xp[:, N + R:]
        A = -np.exp(A_log)
        dt = dtl @ Wdt.T + bdt
        dA = dt[:, :, None] * A[None, :, :]
        dB = dt[:, :, None] * Bm[:, None, :]
        h = h * dA + xt[:, :, None] * dB
        h = np.clip(h, -1.0e6, 1.0e6)
        y = (h * Cm[:, None, :]).sum(-1) + Dvec * xt
        hs.append(h)
    return y, np.stack(hs, axis=1)


def make_params(key, d_inner, d_state, dt_rank):
    """Deterministic parameter init (shapes match the PyTorch __init__)."""
    k1, k2, k3, k4 = jax.random.split(key, 4)
    kx = 1.0 / math.sqrt(d_inner)
    kd = 1.0 / math.sqrt(dt_rank)
    Wx = jax.random.uniform(k1, (dt_rank + 2 * d_state, d_inner),
                            jnp.float32, -kx, kx)           # x_proj.weight
    bx = jax.random.uniform(k2, (dt_rank + 2 * d_state,),
                            jnp.float32, -kx, kx)            # x_proj.bias
    Wdt = jax.random.uniform(k3, (d_inner, dt_rank),
                             jnp.float32, -kd, kd)           # dt_proj.weight
    bdt = jax.random.uniform(k4, (d_inner,), jnp.float32, -kd, kd)
    A = jnp.tile(jnp.arange(1, d_state + 1, dtype=jnp.float32)[None, :],
                 (d_inner, 1))
    A_log = jnp.log(A)                                       # (d_inner, d_state)
    Dvec = jnp.ones((d_inner,), jnp.float32)
    return (Wx, bx, Wdt, bdt, A_log, Dvec)


if __name__ == "__main__":
    batch, seq, d_inner = 2, 16, 32        # d_inner = d_hidden of Modelo
    d_state = 16
    dt_rank = math.ceil(d_inner / 16)      # 2

    key = jax.random.PRNGKey(0)
    kx, kp = jax.random.split(key)
    x = jax.random.normal(kx, (batch, seq, d_inner), jnp.float32)
    params = make_params(kp, d_inner, d_state, dt_rank)

    y, hidden = ssm_forward(x, params)     # seq=16, chunk T=8 -> 2 grid steps
    y = jax.block_until_ready(y)
    hidden = jax.block_until_ready(hidden)

    y_ref, hidden_ref = ssm_reference(np.asarray(x), params)
    assert y.shape == (batch, d_inner)
    assert hidden.shape == (batch, seq, d_inner, d_state)
    np.testing.assert_allclose(np.asarray(y), y_ref, rtol=2e-3, atol=2e-3)
    np.testing.assert_allclose(np.asarray(hidden), hidden_ref,
                               rtol=2e-3, atol=2e-3)
    print("KERNEL_OK")
</pallas_src>

<mosaic_0001>
module attributes {stable_mosaic.version = 11 : i64} {
  func.func @ssm_kernel(%arg0: i32, %arg1: memref<2x8x32xf32, #tpu.memory_space<vmem>>, %arg2: memref<32x64xf32, #tpu.memory_space<vmem>>, %arg3: memref<1x64xf32, #tpu.memory_space<vmem>>, %arg4: memref<16x32xf32, #tpu.memory_space<vmem>>, %arg5: memref<1x32xf32, #tpu.memory_space<vmem>>, %arg6: memref<2x32xf32, #tpu.memory_space<vmem>>, %arg7: memref<2x8x16x32xf32, #tpu.memory_space<vmem>>, %arg8: memref<2x16x32xf32, #tpu.memory_space<vmem>>) attributes {dimension_semantics = [#tpu.dimension_semantics<arbitrary>], iteration_bounds = array<i64: 2>, scalar_prefetch = 0 : i64, scratch_operands = 1 : i64, tpu.core_type = #tpu.core_type<tc>, window_params = [{transform_indices = @transform_0, window_bounds = array<i64: 2, 8, 32>}, {pipeline_mode = #tpu.pipeline_mode<synchronous>, transform_indices = @transform_1, window_bounds = array<i64: 32, 64>}, {pipeline_mode = #tpu.pipeline_mode<synchronous>, transform_indices = @transform_2, window_bounds = array<i64: 1, 64>}, {pipeline_mode = #tpu.pipeline_mode<synchronous>, transform_indices = @transform_3, window_bounds = array<i64: 16, 32>}, {pipeline_mode = #tpu.pipeline_mode<synchronous>, transform_indices = @transform_4, window_bounds = array<i64: 1, 32>}, {pipeline_mode = #tpu.pipeline_mode<synchronous>, transform_indices = @transform_5, window_bounds = array<i64: 2, 32>}, {transform_indices = @transform_6, window_bounds = array<i64: 2, 8, 16, 32>}]} {
    %c0_i32 = arith.constant 0 : i32
    %0 = arith.cmpi eq, %arg0, %c0_i32 : i32
    %1 = arith.extui %0 : i1 to i32
    %c0_i32_0 = arith.constant 0 : i32
    %2 = arith.cmpi ne, %1, %c0_i32_0 : i32
    scf.if %2 {
      %cst_57 = arith.constant 0.000000e+00 : f32
      %244 = vector.broadcast %cst_57 : f32 to vector<2x16x32xf32>
      %c0_58 = arith.constant 0 : index
      %c0_59 = arith.constant 0 : index
      %c0_60 = arith.constant 0 : index
      %245 = vector.load %arg8[%c0_58, %c0_59, %c0_60] : memref<2x16x32xf32, #tpu.memory_space<vmem>>, vector<2x16x32xf32>
      tpu.vector_store %arg8[%c0_58, %c0_59, %c0_60], %244 {strides = array<i32>} : memref<2x16x32xf32, #tpu.memory_space<vmem>>, vector<2x16x32xf32>,
    } else {
    }
    %c0 = arith.constant 0 : index
    %c0_1 = arith.constant 0 : index
    %c0_2 = arith.constant 0 : index
    %3 = vector.load %arg1[%c0, %c0_1, %c0_2] : memref<2x8x32xf32, #tpu.memory_space<vmem>>, vector<2x8x32xf32>
    %4 = vector.shape_cast %3 : vector<2x8x32xf32> to vector<16x32xf32>
    %c0_3 = arith.constant 0 : index
    %c0_4 = arith.constant 0 : index
    %5 = vector.load %arg2[%c0_3, %c0_4] : memref<32x64xf32, #tpu.memory_space<vmem>>, vector<32x64xf32>
    %cst = arith.constant dense<0.000000e+00> : vector<16x64xf32>
    %6 = tpu.matmul %4, %5, %cst {dimension_numbers = #tpu.dot_dimension_numbers<[1], [0], [0], [1], [0, 0, 1, 1], [], []>} : vector<16x32xf32>, vector<32x64xf32>, vector<16x64xf32> -> vector<16x64xf32>
    %c0_5 = arith.constant 0 : index
    %c0_6 = arith.constant 0 : index
    %7 = vector.load %arg3[%c0_5, %c0_6] : memref<1x64xf32, #tpu.memory_space<vmem>>, vector<1x64xf32>
    %8 = vector.broadcast %7 : vector<1x64xf32> to vector<16x64xf32>
    %9 = arith.addf %6, %8 : vector<16x64xf32>
    %10 = vector.extract_strided_slice %9 {offsets = [0, 0], sizes = [16, 16], strides = [1, 1]} : vector<16x64xf32> to vector<16x16xf32>
    %11 = vector.shape_cast %10 : vector<16x16xf32> to vector<2x8x16xf32>
    %12 = vector.extract_strided_slice %9 {offsets = [0, 32], sizes = [16, 32], strides = [1, 1]} : vector<16x64xf32> to vector<16x32xf32>
    %13 = vector.shape_cast %12 : vector<16x32xf32> to vector<2x8x32xf32>
    %c0_7 = arith.constant 0 : index
    %c0_8 = arith.constant 0 : index
    %14 = vector.load %arg4[%c0_7, %c0_8] : memref<16x32xf32, #tpu.memory_space<vmem>>, vector<16x32xf32>
    %c0_9 = arith.constant 0 : index
    %c0_10 = arith.constant 0 : index
    %c0_11 = arith.constant 0 : index
    %15 = vector.load %arg8[%c0_9, %c0_10, %c0_11] : memref<2x16x32xf32, #tpu.memory_space<vmem>>, vector<2x16x32xf32>
    %16 = vector.extract_strided_slice %13 {offsets = [0, 0, 0], sizes = [2, 1, 32], strides = [1, 1, 1]} : vector<2x8x32xf32> to vector<2x1x32xf32>
    %17 = vector.shape_cast %16 : vector<2x1x32xf32> to vector<2x32xf32>
    %18 = vector.shape_cast %17 : vector<2x32xf32> to vector<2x1x32xf32>
    %19 = vector.shape_cast %14 : vector<16x32xf32> to vector<1x16x32xf32>
    %20 = vector.broadcast %18 : vector<2x1x32xf32> to vector<2x16x32xf32>
    %21 = vector.broadcast %19 : vector<1x16x32xf32> to vector<2x16x32xf32>
    %22 = arith.mulf %20, %21 : vector<2x16x32xf32>
    %23 = vector.shape_cast %17 : vector<2x32xf32> to vector<2x1x32xf32>
    %24 = vector.extract_strided_slice %11 {offsets = [0, 0, 0], sizes = [2, 1, 16], strides = [1, 1, 1]} : vector<2x8x16xf32> to vector<2x1x16xf32>
    %25 = vector.shape_cast %24 : vector<2x1x16xf32> to vector<2x16xf32>
    %26 = vector.shape_cast %25 : vector<2x16xf32> to vector<2x16x1xf32>
    %27 = vector.broadcast %23 : vector<2x1x32xf32> to vector<2x16x32xf32>
    %28 = vector.broadcast %26 : vector<2x16x1xf32> to vector<2x16x32xf32>
    %29 = arith.mulf %27, %28 : vector<2x16x32xf32>
    %30 = vector.extract_strided_slice %3 {offsets = [0, 0, 0], sizes = [2, 1, 32], strides = [1, 1, 1]} : vector<2x8x32xf32> to vector<2x1x32xf32>
    %31 = vector.shape_cast %30 : vector<2x1x32xf32> to vector<2x32xf32>
    %32 = arith.mulf %15, %22 : vector<2x16x32xf32>
    %33 = vector.shape_cast %31 : vector<2x32xf32> to vector<2x1x32xf32>
    %34 = vector.broadcast %33 : vector<2x1x32xf32> to vector<2x16x32xf32>
    %35 = arith.mulf %34, %29 : vector<2x16x32xf32>
    %36 = arith.addf %32, %35 : vector<2x16x32xf32>
    %cst_12 = arith.constant -1.000000e+06 : f32
    %cst_13 = arith.constant 1.000000e+06 : f32
    %37 = vector.broadcast %cst_12 : f32 to vector<2x16x32xf32>
    %38 = arith.maximumf %37, %36 : vector<2x16x32xf32>
    %39 = vector.broadcast %cst_13 : f32 to vector<2x16x32xf32>
    %40 = arith.minimumf %39, %38 : vector<2x16x32xf32>
    %c0_14 = arith.constant 0 : index
    %c0_15 = arith.constant 0 : index
    %c0_16 = arith.constant 0 : index
    %c0_17 = arith.constant 0 : index
    %41 = vector.load %arg7[%c0_14, %c0_15, %c0_16, %c0_17] : memref<2x8x16x32xf32, #tpu.memory_space<vmem>>, vector<2x1x16x32xf32>
    %42 = vector.shape_cast %41 : vector<2x1x16x32xf32> to vector<2x16x32xf32>
    %43 = vector.shape_cast %40 : vector<2x16x32xf32> to vector<2x1x16x32xf32>
    tpu.vector_store %arg7[%c0_14, %c0_15, %c0_16, %c0_17], %43 {strides = array<i32>} : memref<2x8x16x32xf32, #tpu.memory_space<vmem>>, vector<2x1x16x32xf32>,
    %44 = vector.extract_strided_slice %13 {offsets = [0, 1, 0], sizes = [2, 1, 32], strides = [1, 1, 1]} : vector<2x8x32xf32> to vector<2x1x32xf32>
    %45 = vector.shape_cast %44 : vector<2x1x32xf32> to vector<2x32xf32>
    %46 = vector.shape_cast %45 : vector<2x32xf32> to vector<2x1x32xf32>
    %47 = vector.shape_cast %14 : vector<16x32xf32> to vector<1x16x32xf32>
    %48 = vector.broadcast %46 : vector<2x1x32xf32> to vector<2x16x32xf32>
    %49 = vector.broadcast %47 : vector<1x16x32xf32> to vector<2x16x32xf32>
    %50 = arith.mulf %48, %49 : vector<2x16x32xf32>
    %51 = vector.shape_cast %45 : vector<2x32xf32> to vector<2x1x32xf32>
    %52 = vector.extract_strided_slice %11 {offsets = [0, 1, 0], sizes = [2, 1, 16], strides = [1, 1, 1]} : vector<2x8x16xf32> to vector<2x1x16xf32>
    %53 = vector.shape_cast %52 : vector<2x1x16xf32> to vector<2x16xf32>
    %54 = vector.shape_cast %53 : vector<2x16xf32> to vector<2x16x1xf32>
    %55 = vector.broadcast %51 : vector<2x1x32xf32> to vector<2x16x32xf32>
    %56 = vector.broadcast %54 : vector<2x16x1xf32> to vector<2x16x32xf32>
    %57 = arith.mulf %55, %56 : vector<2x16x32xf32>
    %58 = vector.extract_strided_slice %3 {offsets = [0, 1, 0], sizes = [2, 1, 32], strides = [1, 1, 1]} : vector<2x8x32xf32> to vector<2x1x32xf32>
    %59 = vector.shape_cast %58 : vector<2x1x32xf32> to vector<2x32xf32>
    %60 = arith.mulf %40, %50 : vector<2x16x32xf32>
    %61 = vector.shape_cast %59 : vector<2x32xf32> to vector<2x1x32xf32>
    %62 = vector.broadcast %61 : vector<2x1x32xf32> to vector<2x16x32xf32>
    %63 = arith.mulf %62, %57 : vector<2x16x32xf32>
    %64 = arith.addf %60, %63 : vector<2x16x32xf32>
    %cst_18 = arith.constant -1.000000e+06 : f32
    %cst_19 = arith.constant 1.000000e+06 : f32
    %65 = vector.broadcast %cst_18 : f32 to vector<2x16x32xf32>
    %66 = arith.maximumf %65, %64 : vector<2x16x32xf32>
    %67 = vector.broadcast %cst_19 : f32 to vector<2x16x32xf32>
    %68 = arith.minimumf %67, %66 : vector<2x16x32xf32>
    %c0_20 = arith.constant 0 : index
    %c1 = arith.constant 1 : index
    %c0_21 = arith.constant 0 : index
    %c0_22 = arith.constant 0 : index
    %69 = vector.load %arg7[%c0_20, %c1, %c0_21, %c0_22] : memref<2x8x16x32xf32, #tpu.memory_space<vmem>>, vector<2x1x16x32xf32>
    %70 = vector.shape_cast %69 : vector<2x1x16x32xf32> to vector<2x16x32xf32>
    %71 = vector.shape_cast %68 : vector<2x16x32xf32> to vector<2x1x16x32xf32>
    tpu.vector_store %arg7[%c0_20, %c1, %c0_21, %c0_22], %71 {strides = array<i32>} : memref<2x8x16x32xf32, #tpu.memory_space<vmem>>, vector<2x1x16x32xf32>,
    %72 = vector.extract_strided_slice %13 {offsets = [0, 2, 0], sizes = [2, 1, 32], strides = [1, 1, 1]} : vector<2x8x32xf32> to vector<2x1x32xf32>
    %73 = vector.shape_cast %72 : vector<2x1x32xf32> to vector<2x32xf32>
    %74 = vector.shape_cast %73 : vector<2x32xf32> to vector<2x1x32xf32>
    %75 = vector.shape_cast %14 : vector<16x32xf32> to vector<1x16x32xf32>
    %76 = vector.broadcast %74 : vector<2x1x32xf32> to vector<2x16x32xf32>
    %77 = vector.broadcast %75 : vector<1x16x32xf32> to vector<2x16x32xf32>
    %78 = arith.mulf %76, %77 : vector<2x16x32xf32>
    %79 = vector.shape_cast %73 : vector<2x32xf32> to vector<2x1x32xf32>
    %80 = vector.extract_strided_slice %11 {offsets = [0, 2, 0], sizes = [2, 1, 16], strides = [1, 1, 1]} : vector<2x8x16xf32> to vector<2x1x16xf32>
    %81 = vector.shape_cast %80 : vector<2x1x16xf32> to vector<2x16xf32>
    %82 = vector.shape_cast %81 : vector<2x16xf32> to vector<2x16x1xf32>
    %83 = vector.broadcast %79 : vector<2x1x32xf32> to vector<2x16x32xf32>
    %84 = vector.broadcast %82 : vector<2x16x1xf32> to vector<2x16x32xf32>
    %85 = arith.mulf %83, %84 : vector<2x16x32xf32>
    %86 = vector.extract_strided_slice %3 {offsets = [0, 2, 0], sizes = [2, 1, 32], strides = [1, 1, 1]} : vector<2x8x32xf32> to vector<2x1x32xf32>
    %87 = vector.shape_cast %86 : vector<2x1x32xf32> to vector<2x32xf32>
    %88 = arith.mulf %68, %78 : vector<2x16x32xf32>
    %89 = vector.shape_cast %87 : vector<2x32xf32> to vector<2x1x32xf32>
    %90 = vector.broadcast %89 : vector<2x1x32xf32> to vector<2x16x32xf32>
    %91 = arith.mulf %90, %85 : vector<2x16x32xf32>
    %92 = arith.addf %88, %91 : vector<2x16x32xf32>
    %cst_23 = arith.constant -1.000000e+06 : f32
    %cst_24 = arith.constant 1.000000e+06 : f32
    %93 = vector.broadcast %cst_23 : f32 to vector<2x16x32xf32>
    %94 = arith.maximumf %93, %92 : vector<2x16x32xf32>
    %95 = vector.broadcast %cst_24 : f32 to vector<2x16x32xf32>
    %96 = arith.minimumf %95, %94 : vector<2x16x32xf32>
    %c0_25 = arith.constant 0 : index
    %c2 = arith.constant 2 : index
    %c0_26 = arith.constant 0 : index
    %c0_27 = arith.constant 0 : index
    %97 = vector.load %arg7[%c0_25, %c2, %c0_26, %c0_27] : memref<2x8x16x32xf32, #tpu.memory_space<vmem>>, vector<2x1x16x32xf32>
    %98 = vector.shape_cast %97 : vector<2x1x16x32xf32> to vector<2x16x32xf32>
    %99 = vector.shape_cast %96 : vector<2x16x32xf32> to vector<2x1x16x32xf32>
    tpu.vector_store %arg7[%c0_25, %c2, %c0_26, %c0_27], %99 {strides = array<i32>} : memref<2x8x16x32xf32, #tpu.memory_space<vmem>>, vector<2x1x16x32xf32>,
    %100 = vector.extract_strided_slice %13 {offsets = [0, 3, 0], sizes = [2, 1, 32], strides = [1, 1, 1]} : vector<2x8x32xf32> to vector<2x1x32xf32>
    %101 = vector.shape_cast %100 : vector<2x1x32xf32> to vector<2x32xf32>
    %102 = vector.shape_cast %101 : vector<2x32xf32> to vector<2x1x32xf32>
    %103 = vector.shape_cast %14 : vector<16x32xf32> to vector<1x16x32xf32>
    %104 = vector.broadcast %102 : vector<2x1x32xf32> to vector<2x16x32xf32>
    %105 = vector.broadcast %103 : vector<1x16x32xf32> to vector<2x16x32xf32>
    %106 = arith.mulf %104, %105 : vector<2x16x32xf32>
    %107 = vector.shape_cast %101 : vector<2x32xf32> to vector<2x1x32xf32>
    %108 = vector.extract_strided_slice %11 {offsets = [0, 3, 0], sizes = [2, 1, 16], strides = [1, 1, 1]} : vector<2x8x16xf32> to vector<2x1x16xf32>
    %109 = vector.shape_cast %108 : vector<2x1x16xf32> to vector<2x16xf32>
    %110 = vector.shape_cast %109 : vector<2x16xf32> to vector<2x16x1xf32>
    %111 = vector.broadcast %107 : vector<2x1x32xf32> to vector<2x16x32xf32>
    %112 = vector.broadcast %110 : vector<2x16x1xf32> to vector<2x16x32xf32>
    %113 = arith.mulf %111, %112 : vector<2x16x32xf32>
    %114 = vector.extract_strided_slice %3 {offsets = [0, 3, 0], sizes = [2, 1, 32], strides = [1, 1, 1]} : vector<2x8x32xf32> to vector<2x1x32xf32>
    %115 = vector.shape_cast %114 : vector<2x1x32xf32> to vector<2x32xf32>
    %116 = arith.mulf %96, %106 : vector<2x16x32xf32>
    %117 = vector.shape_cast %115 : vector<2x32xf32> to vector<2x1x32xf32>
    %118 = vector.broadcast %117 : vector<2x1x32xf32> to vector<2x16x32xf32>
    %119 = arith.mulf %118, %113 : vector<2x16x32xf32>
    %120 = arith.addf %116, %119 : vector<2x16x32xf32>
    %cst_28 = arith.constant -1.000000e+06 : f32
    %cst_29 = arith.constant 1.000000e+06 : f32
    %121 = vector.broadcast %cst_28 : f32 to vector<2x16x32xf32>
    %122 = arith.maximumf %121, %120 : vector<2x16x32xf32>
    %123 = vector.broadcast %cst_29 : f32 to vector<2x16x32xf32>
    %124 = arith.minimumf %123, %122 : vector<2x16x32xf32>
    %c0_30 = arith.constant 0 : index
    %c3 = arith.constant 3 : index
    %c0_31 = arith.constant 0 : index
    %c0_32 = arith.constant 0 : index
    %125 = vector.load %arg7[%c0_30, %c3, %c0_31, %c0_32] : memref<2x8x16x32xf32, #tpu.memory_space<vmem>>, vector<2x1x16x32xf32>
    %126 = vector.shape_cast %125 : vector<2x1x16x32xf32> to vector<2x16x32xf32>
    %127 = vector.shape_cast %124 : vector<2x16x32xf32> to vector<2x1x16x32xf32>
    tpu.vector_store %arg7[%c0_30, %c3, %c0_31, %c0_32], %127 {strides = array<i32>} : memref<2x8x16x32xf32, #tpu.memory_space<vmem>>, vector<2x1x16x32xf32>,
    %128 = vector.extract_strided_slice %13 {offsets = [0, 4, 0], sizes = [2, 1, 32], strides = [1, 1, 1]} : vector<2x8x32xf32> to vector<2x1x32xf32>
    %129 = vector.shape_cast %128 : vector<2x1x32xf32> to vector<2x32xf32>
    %130 = vector.shape_cast %129 : vector<2x32xf32> to vector<2x1x32xf32>
    %131 = vector.shape_cast %14 : vector<16x32xf32> to vector<1x16x32xf32>
    %132 = vector.broadcast %130 : vector<2x1x32xf32> to vector<2x16x32xf32>
    %133 = vector.broadcast %131 : vector<1x16x32xf32> to vector<2x16x32xf32>
    %134 = arith.mulf %132, %133 : vector<2x16x32xf32>
    %135 = vector.shape_cast %129 : vector<2x32xf32> to vector<2x1x32xf32>
    %136 = vector.extract_strided_slice %11 {offsets = [0, 4, 0], sizes = [2, 1, 16], strides = [1, 1, 1]} : vector<2x8x16xf32> to vector<2x1x16xf32>
    %137 = vector.shape_cast %136 : vector<2x1x16xf32> to vector<2x16xf32>
    %138 = vector.shape_cast %137 : vector<2x16xf32> to vector<2x16x1xf32>
    %139 = vector.broadcast %135 : vector<2x1x32xf32> to vector<2x16x32xf32>
    %140 = vector.broadcast %138 : vector<2x16x1xf32> to vector<2x16x32xf32>
    %141 = arith.mulf %139, %140 : vector<2x16x32xf32>
    %142 = vector.extract_strided_slice %3 {offsets = [0, 4, 0], sizes = [2, 1, 32], strides = [1, 1, 1]} : vector<2x8x32xf32> to vector<2x1x32xf32>
    %143 = vector.shape_cast %142 : vector<2x1x32xf32> to vector<2x32xf32>
    %144 = arith.mulf %124, %134 : vector<2x16x32xf32>
    %145 = vector.shape_cast %143 : vector<2x32xf32> to vector<2x1x32xf32>
    %146 = vector.broadcast %145 : vector<2x1x32xf32> to vector<2x16x32xf32>
    %147 = arith.mulf %146, %141 : vector<2x16x32xf32>
    %148 = arith.addf %144, %147 : vector<2x16x32xf32>
    %cst_33 = arith.constant -1.000000e+06 : f32
    %cst_34 = arith.constant 1.000000e+06 : f32
    %149 = vector.broadcast %cst_33 : f32 to vector<2x16x32xf32>
    %150 = arith.maximumf %149, %148 : vector<2x16x32xf32>
    %151 = vector.broadcast %cst_34 : f32 to vector<2x16x32xf32>
    %152 = arith.minimumf %151, %150 : vector<2x16x32xf32>
    %c0_35 = arith.constant 0 : index
    %c4 = arith.constant 4 : index
    %c0_36 = arith.constant 0 : index
    %c0_37 = arith.constant 0 : index
    %153 = vector.load %arg7[%c0_35, %c4, %c0_36, %c0_37] : memref<2x8x16x32xf32, #tpu.memory_space<vmem>>, vector<2x1x16x32xf32>
    %154 = vector.shape_cast %153 : vector<2x1x16x32xf32> to vector<2x16x32xf32>
    %155 = vector.shape_cast %152 : vector<2x16x32xf32> to vector<2x1x16x32xf32>
    tpu.vector_store %arg7[%c0_35, %c4, %c0_36, %c0_37], %155 {strides = array<i32>} : memref<2x8x16x32xf32, #tpu.memory_space<vmem>>, vector<2x1x16x32xf32>,
    %156 = vector.extract_strided_slice %13 {offsets = [0, 5, 0], sizes = [2, 1, 32], strides = [1, 1, 1]} : vector<2x8x32xf32> to vector<2x1x32xf32>
    %157 = vector.shape_cast %156 : vector<2x1x32xf32> to vector<2x32xf32>
    %158 = vector.shape_cast %157 : vector<2x32xf32> to vector<2x1x32xf32>
    %159 = vector.shape_cast %14 : vector<16x32xf32> to vector<1x16x32xf32>
    %160 = vector.broadcast %158 : vector<2x1x32xf32> to vector<2x16x32xf32>
    %161 = vector.broadcast %159 : vector<1x16x32xf32> to vector<2x16x32xf32>
    %162 = arith.mulf %160, %161 : vector<2x16x32xf32>
    %163 = vector.shape_cast %157 : vector<2x32xf32> to vector<2x1x32xf32>
    %164 = vector.extract_strided_slice %11 {offsets = [0, 5, 0], sizes = [2, 1, 16], strides = [1, 1, 1]} : vector<2x8x16xf32> to vector<2x1x16xf32>
    %165 = vector.shape_cast %164 : vector<2x1x16xf32> to vector<2x16xf32>
    %166 = vector.shape_cast %165 : vector<2x16xf32> to vector<2x16x1xf32>
    %167 = vector.broadcast %163 : vector<2x1x32xf32> to vector<2x16x32xf32>
    %168 = vector.broadcast %166 : vector<2x16x1xf32> to vector<2x16x32xf32>
    %169 = arith.mulf %167, %168 : vector<2x16x32xf32>
    %170 = vector.extract_strided_slice %3 {offsets = [0, 5, 0], sizes = [2, 1, 32], strides = [1, 1, 1]} : vector<2x8x32xf32> to vector<2x1x32xf32>
    %171 = vector.shape_cast %170 : vector<2x1x32xf32> to vector<2x32xf32>
    %172 = arith.mulf %152, %162 : vector<2x16x32xf32>
    %173 = vector.shape_cast %171 : vector<2x32xf32> to vector<2x1x32xf32>
    %174 = vector.broadcast %173 : vector<2x1x32xf32> to vector<2x16x32xf32>
    %175 = arith.mulf %174, %169 : vector<2x16x32xf32>
    %176 = arith.addf %172, %175 : vector<2x16x32xf32>
    %cst_38 = arith.constant -1.000000e+06 : f32
    %cst_39 = arith.constant 1.000000e+06 : f32
    %177 = vector.broadcast %cst_38 : f32 to vector<2x16x32xf32>
    %178 = arith.maximumf %177, %176 : vector<2x16x32xf32>
    %179 = vector.broadcast %cst_39 : f32 to vector<2x16x32xf32>
    %180 = arith.minimumf %179, %178 : vector<2x16x32xf32>
    %c0_40 = arith.constant 0 : index
    %c5 = arith.constant 5 : index
    %c0_41 = arith.constant 0 : index
    %c0_42 = arith.constant 0 : index
    %181 = vector.load %arg7[%c0_40, %c5, %c0_41, %c0_42] : memref<2x8x16x32xf32, #tpu.memory_space<vmem>>, vector<2x1x16x32xf32>
    %182 = vector.shape_cast %181 : vector<2x1x16x32xf32> to vector<2x16x32xf32>
    %183 = vector.shape_cast %180 : vector<2x16x32xf32> to vector<2x1x16x32xf32>
    tpu.vector_store %arg7[%c0_40, %c5, %c0_41, %c0_42], %183 {strides = array<i32>} : memref<2x8x16x32xf32, #tpu.memory_space<vmem>>, vector<2x1x16x32xf32>,
    %184 = vector.extract_strided_slice %13 {offsets = [0, 6, 0], sizes = [2, 1, 32], strides = [1, 1, 1]} : vector<2x8x32xf32> to vector<2x1x32xf32>
    %185 = vector.shape_cast %184 : vector<2x1x32xf32> to vector<2x32xf32>
    %186 = vector.shape_cast %185 : vector<2x32xf32> to vector<2x1x32xf32>
    %187 = vector.shape_cast %14 : vector<16x32xf32> to vector<1x16x32xf32>
    %188 = vector.broadcast %186 : vector<2x1x32xf32> to vector<2x16x32xf32>
    %189 = vector.broadcast %187 : vector<1x16x32xf32> to vector<2x16x32xf32>
    %190 = arith.mulf %188, %189 : vector<2x16x32xf32>
    %191 = vector.shape_cast %185 : vector<2x32xf32> to vector<2x1x32xf32>
    %192 = vector.extract_strided_slice %11 {offsets = [0, 6, 0], sizes = [2, 1, 16], strides = [1, 1, 1]} : vector<2x8x16xf32> to vector<2x1x16xf32>
    %193 = vector.shape_cast %192 : vector<2x1x16xf32> to vector<2x16xf32>
    %194 = vector.shape_cast %193 : vector<2x16xf32> to vector<2x16x1xf32>
    %195 = vector.broadcast %191 : vector<2x1x32xf32> to vector<2x16x32xf32>
    %196 = vector.broadcast %194 : vector<2x16x1xf32> to vector<2x16x32xf32>
    %197 = arith.mulf %195, %196 : vector<2x16x32xf32>
    %198 = vector.extract_strided_slice %3 {offsets = [0, 6, 0], sizes = [2, 1, 32], strides = [1, 1, 1]} : vector<2x8x32xf32> to vector<2x1x32xf32>
    %199 = vector.shape_cast %198 : vector<2x1x32xf32> to vector<2x32xf32>
    %200 = arith.mulf %180, %190 : vector<2x16x32xf32>
    %201 = vector.shape_cast %199 : vector<2x32xf32> to vector<2x1x32xf32>
    %202 = vector.broadcast %201 : vector<2x1x32xf32> to vector<2x16x32xf32>
    %203 = arith.mulf %202, %197 : vector<2x16x32xf32>
    %204 = arith.addf %200, %203 : vector<2x16x32xf32>
    %cst_43 = arith.constant -1.000000e+06 : f32
    %cst_44 = arith.constant 1.000000e+06 : f32
    %205 = vector.broadcast %cst_43 : f32 to vector<2x16x32xf32>
    %206 = arith.maximumf %205, %204 : vector<2x16x32xf32>
    %207 = vector.broadcast %cst_44 : f32 to vector<2x16x32xf32>
    %208 = arith.minimumf %207, %206 : vector<2x16x32xf32>
    %c0_45 = arith.constant 0 : index
    %c6 = arith.constant 6 : index
    %c0_46 = arith.constant 0 : index
    %c0_47 = arith.constant 0 : index
    %209 = vector.load %arg7[%c0_45, %c6, %c0_46, %c0_47] : memref<2x8x16x32xf32, #tpu.memory_space<vmem>>, vector<2x1x16x32xf32>
    %210 = vector.shape_cast %209 : vector<2x1x16x32xf32> to vector<2x16x32xf32>
    %211 = vector.shape_cast %208 : vector<2x16x32xf32> to vector<2x1x16x32xf32>
    tpu.vector_store %arg7[%c0_45, %c6, %c0_46, %c0_47], %211 {strides = array<i32>} : memref<2x8x16x32xf32, #tpu.memory_space<vmem>>, vector<2x1x16x32xf32>,
    %212 = vector.extract_strided_slice %13 {offsets = [0, 7, 0], sizes = [2, 1, 32], strides = [1, 1, 1]} : vector<2x8x32xf32> to vector<2x1x32xf32>
    %213 = vector.shape_cast %212 : vector<2x1x32xf32> to vector<2x32xf32>
    %214 = vector.shape_cast %213 : vector<2x32xf32> to vector<2x1x32xf32>
    %215 = vector.shape_cast %14 : vector<16x32xf32> to vector<1x16x32xf32>
    %216 = vector.broadcast %214 : vector<2x1x32xf32> to vector<2x16x32xf32>
    %217 = vector.broadcast %215 : vector<1x16x32xf32> to vector<2x16x32xf32>
    %218 = arith.mulf %216, %217 : vector<2x16x32xf32>
    %219 = vector.shape_cast %213 : vector<2x32xf32> to vector<2x1x32xf32>
    %220 = vector.extract_strided_slice %11 {offsets = [0, 7, 0], sizes = [2, 1, 16], strides = [1, 1, 1]} : vector<2x8x16xf32> to vector<2x1x16xf32>
    %221 = vector.shape_cast %220 : vector<2x1x16xf32> to vector<2x16xf32>
    %222 = vector.shape_cast %221 : vector<2x16xf32> to vector<2x16x1xf32>
    %223 = vector.broadcast %219 : vector<2x1x32xf32> to vector<2x16x32xf32>
    %224 = vector.broadcast %222 : vector<2x16x1xf32> to vector<2x16x32xf32>
    %225 = arith.mulf %223, %224 : vector<2x16x32xf32>
    %226 = vector.extract_strided_slice %3 {offsets = [0, 7, 0], sizes = [2, 1, 32], strides = [1, 1, 1]} : vector<2x8x32xf32> to vector<2x1x32xf32>
    %227 = vector.shape_cast %226 : vector<2x1x32xf32> to vector<2x32xf32>
    %228 = arith.mulf %208, %218 : vector<2x16x32xf32>
    %229 = vector.shape_cast %227 : vector<2x32xf32> to vector<2x1x32xf32>
    %230 = vector.broadcast %229 : vector<2x1x32xf32> to vector<2x16x32xf32>
    %231 = arith.mulf %230, %225 : vector<2x16x32xf32>
    %232 = arith.addf %228, %231 : vector<2x16x32xf32>
    %cst_48 = arith.constant -1.000000e+06 : f32
    %cst_49 = arith.constant 1.000000e+06 : f32
    %233 = vector.broadcast %cst_48 : f32 to vector<2x16x32xf32>
    %234 = arith.maximumf %233, %232 : vector<2x16x32xf32>
    %235 = vector.broadcast %cst_49 : f32 to vector<2x16x32xf32>
    %236 = arith.minimumf %235, %234 : vector<2x16x32xf32>
    %c0_50 = arith.constant 0 : index
    %c7 = arith.constant 7 : index
    %c0_51 = arith.constant 0 : index
    %c0_52 = arith.constant 0 : index
    %237 = vector.load %arg7[%c0_50, %c7, %c0_51, %c0_52] : memref<2x8x16x32xf32, #tpu.memory_space<vmem>>, vector<2x1x16x32xf32>
    %238 = vector.shape_cast %237 : vector<2x1x16x32xf32> to vector<2x16x32xf32>
    %239 = vector.shape_cast %236 : vector<2x16x32xf32> to vector<2x1x16x32xf32>
    tpu.vector_store %arg7[%c0_50, %c7, %c0_51, %c0_52], %239 {strides = array<i32>} : memref<2x8x16x32xf32, #tpu.memory_space<vmem>>, vector<2x1x16x32xf32>,
    %c0_53 = arith.constant 0 : index
    %c0_54 = arith.constant 0 : index
    %c0_55 = arith.constant 0 : index
    %240 = vector.load %arg8[%c0_53, %c0_54, %c0_55] : memref<2x16x32xf32, #tpu.memory_space<vmem>>, vector<2x16x32xf32>
    tpu.vector_store %arg8[%c0_53, %c0_54, %c0_55], %236 {strides = array<i32>} : memref<2x16x32xf32, #tpu.memory_space<vmem>>, vector<2x16x32xf32>,
    %c1_i32 = arith.constant 1 : i32
    %241 = arith.cmpi eq, %arg0, %c1_i32 : i32
    %242 = arith.extui %241 : i1 to i32
    %c0_i32_56 = arith.constant 0 : i32
    %243 = arith.cmpi ne, %242, %c0_i32_56 : i32
    scf.if %243 {
      %244 = vector.extract_strided_slice %9 {offsets = [0, 16], sizes = [16, 16], strides = [1, 1]} : vector<16x64xf32> to vector<16x16xf32>
      %245 = vector.shape_cast %244 : vector<16x16xf32> to vector<2x8x16xf32>
      %246 = vector.extract_strided_slice %245 {offsets = [0, 7, 0], sizes = [2, 1, 16], strides = [1, 1, 1]} : vector<2x8x16xf32> to vector<2x1x16xf32>
      %247 = vector.shape_cast %246 : vector<2x1x16xf32> to vector<2x16xf32>
      %248 = vector.shape_cast %247 : vector<2x16xf32> to vector<2x16x1xf32>
      %249 = vector.broadcast %248 : vector<2x16x1xf32> to vector<2x16x32xf32>
      %250 = arith.mulf %236, %249 : vector<2x16x32xf32>
      %cst_57 = arith.constant dense<0.000000e+00> : vector<2x32xf32>
      %251 = vector.multi_reduction <add>, %250, %cst_57 [1] : vector<2x16x32xf32> to vector<2x32xf32>
      %c0_58 = arith.constant 0 : index
      %c0_59 = arith.constant 0 : index
      %252 = vector.load %arg5[%c0_58, %c0_59] : memref<1x32xf32, #tpu.memory_space<vmem>>, vector<1x32xf32>
      %253 = vector.extract_strided_slice %3 {offsets = [0, 7, 0], sizes = [2, 1, 32], strides = [1, 1, 1]} : vector<2x8x32xf32> to vector<2x1x32xf32>
      %254 = vector.shape_cast %253 : vector<2x1x32xf32> to vector<2x32xf32>
      %255 = vector.broadcast %252 : vector<1x32xf32> to vector<2x32xf32>
      %256 = arith.mulf %255, %254 : vector<2x32xf32>
      %257 = arith.addf %251, %256 : vector<2x32xf32>
      %c0_60 = arith.constant 0 : index
      %c0_61 = arith.constant 0 : index
      %258 = vector.load %arg6[%c0_60, %c0_61] : memref<2x32xf32, #tpu.memory_space<vmem>>, vector<2x32xf32>
      tpu.vector_store %arg6[%c0_60, %c0_61], %257 {strides = array<i32>} : memref<2x32xf32, #tpu.memory_space<vmem>>, vector<2x32xf32>,
    } else {
    }
    return
  }
  func.func @transform_0(%arg0: i32) -> (i32, i32, i32) {
    %c0_i32 = arith.constant 0 : i32
    %c0_i32_0 = arith.constant 0 : i32
    %c0_i32_1 = arith.constant 0 : i32
    return %c0_i32, %arg0, %c0_i32_0 : i32, i32, i32
  }
  func.func @transform_1(%arg0: i32) -> (i32, i32) {
    %c0_i32 = arith.constant 0 : i32
    %c0_i32_0 = arith.constant 0 : i32
    %c0_i32_1 = arith.constant 0 : i32
    return %c0_i32, %c0_i32_0 : i32, i32
  }
  func.func @transform_2(%arg0: i32) -> (i32, i32) {
    %c0_i32 = arith.constant 0 : i32
    %c0_i32_0 = arith.constant 0 : i32
    %c0_i32_1 = arith.constant 0 : i32
    return %c0_i32, %c0_i32_0 : i32, i32
  }
  func.func @transform_3(%arg0: i32) -> (i32, i32) {
    %c0_i32 = arith.constant 0 : i32
    %c0_i32_0 = arith.constant 0 : i32
    %c0_i32_1 = arith.constant 0 : i32
    return %c0_i32, %c0_i32_0 : i32, i32
  }
  func.func @transform_4(%arg0: i32) -> (i32, i32) {
    %c0_i32 = arith.constant 0 : i32
    %c0_i32_0 = arith.constant 0 : i32
    %c0_i32_1 = arith.constant 0 : i32
    return %c0_i32, %c0_i32_0 : i32, i32
  }
  func.func @transform_5(%arg0: i32) -> (i32, i32) {
    %c0_i32 = arith.constant 0 : i32
    %c0_i32_0 = arith.constant 0 : i32
    %c0_i32_1 = arith.constant 0 : i32
    return %c0_i32, %c0_i32_0 : i32, i32
  }
  func.func @transform_6(%arg0: i32) -> (i32, i32, i32, i32) {
    %c0_i32 = arith.constant 0 : i32
    %c0_i32_0 = arith.constant 0 : i32
    %c0_i32_1 = arith.constant 0 : i32
    %c0_i32_2 = arith.constant 0 : i32
    return %c0_i32, %arg0, %c0_i32_0, %c0_i32_1 : i32, i32, i32, i32
  }
}

</mosaic_0001>

<bundles_post_ra>
// kernel: tpu_custom_call.1
= control target key start
LH: loop header
LB: loop body
LE: loop exit
PB: predicated region body
PF: predicated region fallthrough
CT: control target
= control target key end

     0   :  { %12 = vsyncpa [#allocation4], 0  ;;  %s2566_s0 = inlined_call_operand.hbm [shape: f32[2,16,32], index: 0, kind: input, shape index: {}]   ;;  %s2567_s1 = inlined_call_operand.hbm [shape: f32[32,64], index: 1, kind: input, shape index: {}]   ;;  %s2568_s2 = inlined_call_operand.vmem [shape: f32[1,64], index: 2, kind: input, shape index: {}]   ;;  %s2569_s3 = inlined_call_operand.hbm [shape: f32[16,32], index: 3, kind: input, shape index: {}]   ;;  %s2570_s4 = inlined_call_operand.vmem [shape: f32[1,32], index: 4, kind: input, shape index: {}]   ;;  %s2571_s5 = inlined_call_operand.hbm [shape: f32[2,32], index: 5, kind: output, shape index: {0}]   ;;  %s2572_s6 = inlined_call_operand.hbm [shape: f32[2,16,16,32], index: 6, kind: output, shape index: {1}]  }
   0x1   :  { %14 = vsyncpa [#allocation4 + $0x1], 0 }
   0x2   :  { %15 = vsyncpa [#allocation7], 0 }
   0x3   :  { %16 = vsyncpa [#allocation5], 0 }
   0x4   :  { %17 = vsyncpa [#allocation11], 0 }
   0x5   :  { %19 = vsyncpa [#allocation11 + $0x1], 0  ;;  %s1825_s21 = smov 0   ;;  %s1827_s22 = smov 0  }
   0x6   :  { %s1829_s23 = smov 0   ;;  %s1831_s24 = smov 0  }
   0x7 LB: > { %s1846_s25 = sadd.s32 4294967295, %s1771_s24   ;;  %s1407_s26 = sadd.s32 4294967294, %s1771_s24   ;;  %s1771_s24 = sphi %s1831_s24, %s2609_s24   ;;  %s1767_s23 = sphi %s1829_s23, %s2608_s23   ;;  %s1763_s22 = sphi %s1827_s22, %s2607_s22   ;;  %s1759_s21 = sphi %s1825_s21, %s2606_s21  }
   0x8   : > { %s1850_s27 = sadd.s32 1, %s1771_s24   ;;  %s32_s28 = sadd.s32 1, %s1767_s23 }
   0x9   : > { %s29_s29 = ssub.s32 %s1771_s24, %s1850_s27  ;;  %p39_p0 = scmp.ne.s32.totalorder %s1767_s23, %s1763_s22 }
   0xa   : > { %p30_p1 = scmp.eq.s32.totalorder %s29_s29, 0  ;;  %p40_p2 = scmp.eq.s32.totalorder %s1771_s24, 0 }
   0xb   : > { %p45_p3 = scmp.ne.s32.totalorder %s1763_s22, %s1759_s21  ;;  %p2574_p4 = scmp.eq.s32.totalorder %s1846_s25, 0 }
   0xc   : > { %s1862_s30 = scalar_select %p30_p1, %s1767_s23, %s32_s28  }
   0xd   : > { %p1864_p5 = por %p40_p2, %p39_p0  ;;  %p1870_p6 = por %p2574_p4, %p45_p3 }
   0xe   : > { %2580 = sst [smem:[#allocation18_spill]] %s1862_s30  ;;  %p2573_p7 = scmp.eq.s32.totalorder %s1846_s25, 1 }
   0xf   : > { %s2581_s7 = scalar_select %p1864_p5, 1, 0 }
  0x10   : > { %s2582_s8 = scalar_select %p1870_p6, 1, 0 }
  0x11   : > { %p180_p8 = scmp.eq.s32.totalorder %s1407_s26, 1  ;;  %p1408_p9 = scmp.ge.s32.totalorder %s1771_s24, 1 }
  0x12   : > { %p187_p10 = scmp.lt.s32.totalorder %s1771_s24, 3  ;;  %p1879_p11 = por %p2573_p7, %p39_p0 }
  0x13   : > { %p1883_p12 = por %p180_p8, %p45_p3  ;;  %s1773_s12 = smov [#allocation6]  }
  0x14   : > { %s2583_s9 = scalar_select %p1879_p11, 1, 0 }
  0x15   : > { %s2584_s10 = scalar_select %p1883_p12, 1, 0 }
  0x16   : > { %p1887_p13 = pnand %p1408_p9, %p187_p10  ;;  %s199_s13 = sshll.u32 %s1773_s12, 4  ;;  %s200_s13 = int_to_ptr.vmem [resolvable:$true] %s199_s13 }
  0x17   : > { %s1774_s15 = smov [#allocation8]   ;;  %s1613_s19 = scalar_lea.hbm %s2567_s1, 512 }
  0x18   : > { %s2585_s11 = scalar_select %p1887_p13, 1, 0 }
  0x19   : > { %p1542_p2 = pneg %p1887_p13  ;;  %s215_s16 = sshll.u32 %s1774_s15, 4  ;;  %s216_s16 = int_to_ptr.vmem [resolvable:$true] %s215_s16 }
  0x1a   : > { %p1614_p9 = scmp.ne.s32.totalorder %s2567_s1, %s1613_s19  ;;  %p1620_p3 = scmp.lt.u32.totalorder %s1613_s19, %s2567_s1 }
  0x1b   : > { %p1896_p0 = pnand %p1542_p2, %p2574_p4 }
  0x1d   : > { %p1615_p10 = pneg %p1896_p0 }
  0x1f   : > { %p1616_p2 = pnand %p1615_p10, %p1614_p9 }
  0x21   : > { %p1617_p7 = pneg %p1616_p2 }
  0x23   : > { %p1622_p1 = pnand %p1620_p3, %p1617_p7 }
  0x25   : > { %1625 = shalt.err (!%p1622_p1)
}
  0x26   : > { %s1626_s12 = scalar_lea.vmem %s200_s13, 512  ;;  %p1634_p11 = scmp.lt.s32.totalorder %s200_s13, %s200_s13 }
  0x27   : > { %p1627_p4 = scmp.ne.s32.totalorder %s200_s13, %s1626_s12  ;;  %p1635_p6 = scmp.lt.s32.totalorder %s1626_s12, %s1626_s12 }
  0x29   : > { %p1629_p8 = pnand %p1627_p4, %p1615_p10  ;;  %p1636_p13 = por %p1635_p6, %p1634_p11 }
  0x2b   : > { %p1630_p12 = pneg %p1629_p8 }
  0x2d   : > { %p1637_p5 = pnand %p1636_p13, %p1630_p12 }
  0x2f   : > { %1640 = shalt.err (!%p1637_p5)
}
  0x30   : > { %s2579_s15 = smov 128   ;;  %s1776_s17 = smov 8  }
  0x31   : > { %1545 = dma.hbm_to_vmem [thread:$0]  (!%p1896_p0), %s2567_s1, 512, %s200_s13, [#allocation7], %s2579_s15, %s2579_s15, %s1776_s17  }
  0x32   : > { %p2587_p4 = scmp.ne.s32.totalorder %s2581_s7, 0  ;;  %p2588_p7 = scmp.lt.s32.totalorder %s1771_s24, 2 }
  0x33   : > { %s1641_s29 = scalar_lea.hbm %s2569_s3, 256 }
  0x34   : > { %p1931_p1 = pnand %p2588_p7, %p2587_p4  ;;  %p1642_p5 = scmp.ne.s32.totalorder %s2569_s3, %s1641_s29 }
  0x35   : > { %p1648_p12 = scmp.lt.u32.totalorder %s1641_s29, %s2569_s3 }
  0x36   : > { %s2589_s20 = scalar_select %p1931_p1, 1, 0 }
  0x37   : > { %p1644_p6 = pnand %p1642_p5, %p1615_p10 }
  0x39   : > { %p1645_p11 = pneg %p1644_p6 }
  0x3b   : > { %p1650_p13 = pnand %p1648_p12, %p1645_p11 }
  0x3d   : > { %1653 = shalt.err (!%p1650_p13)
}
  0x3e   : > { %s1654_s18 = scalar_lea.vmem %s216_s16, 256  ;;  %p1662_p2 = scmp.lt.s32.totalorder %s216_s16, %s216_s16 }
  0x3f   : > { %p1655_p3 = scmp.ne.s32.totalorder %s216_s16, %s1654_s18  ;;  %p1663_p4 = scmp.lt.s32.totalorder %s1654_s18, %s1654_s18 }
  0x41   : > { %p1657_p8 = pnand %p1655_p3, %p1615_p10  ;;  %p1664_p7 = por %p1663_p4, %p1662_p2 }
  0x43   : > { %p1658_p9 = pneg %p1657_p8 }
  0x45   : > { %p1665_p1 = pnand %p1664_p7, %p1658_p9 }
  0x47   : > { %1668 = shalt.err (!%p1665_p1)
}
  0x48   : > { %1548 = dma.hbm_to_vmem [thread:$0]  (!%p1896_p0), %s2569_s3, 256, %s216_s16, [#allocation7], %s2579_s15, %s2579_s15, %s1776_s17  }
  0x49   : > { %s232_s26 = sand.u32 1, %s1767_s23   ;;  %s1413_s29 = sshll.u32 %s1771_s24, 7 }
  0x4a   : > { %s1412_s28 = sshll.u32 %s232_s26, 4  ;;  %s1963_s7 = scalar_lea.hbm %s2566_s0, %s1413_s29 }
  0x4b   : > { %s236_s14 = scalar_lea.vmem [#allocation3], %s1412_s28  ;;  %s1967_s30 = scalar_lea.sflag [#allocation4], %s232_s26 }
  0x4c   : > { %s242_s18 = sshll.u32 %s236_s14, 4  ;;  %s1669_s19 = scalar_lea.hbm %s1963_s7, 256  ;;  %s1965_s18 = int_to_ptr.vmem [resolvable:$true] %s242_s18 }
  0x4d   : > { %p1670_p0 = scmp.ne.s32.totalorder %s1963_s7, %s1669_s19  ;;  %p2590_p10 = scmp.ne.s32.totalorder %s2589_s20, 0 }
  0x4e   : > { %s1674_s12 = scalar_lea.hbm %s2566_s0, 512  ;;  %p1675_p11 = scmp.lt.u32.totalorder %s1963_s7, %s2566_s0 }
  0x4f   : > { %p1671_p1 = pneg %p2590_p10  ;;  %p1676_p12 = scmp.lt.u32.totalorder %s1674_s12, %s1669_s19 }
  0x50   : > { %p1678_p3 = scmp.lt.u32.totalorder %s1669_s19, %s1963_s7 }
  0x51   : > { %p1672_p5 = pnand %p1671_p1, %p1670_p0  ;;  %p1677_p13 = por %p1676_p12, %p1675_p11 }
  0x53   : > { %p1673_p6 = pneg %p1672_p5  ;;  %p1679_p8 = por %p1678_p3, %p1677_p13 }
  0x55   : > { %p1680_p9 = pnand %p1679_p8, %p1673_p6 }
  0x57   : > { %1683 = shalt.err (!%p1680_p9)
}
  0x58   : > { %s1684_s26 = scalar_lea.vmem %s1965_s18, 256  ;;  %s1777_s28 = smov [#allocation3]  }
  0x59   : > { %p1685_p2 = scmp.ne.s32.totalorder %s1965_s18, %s1684_s26  ;;  %s1689_s14 = sshll.u32 %s1777_s28, 4  ;;  %s1690_s14 = int_to_ptr.vmem [resolvable:$false] %s1689_s14 }
  0x5a   : > { %s1691_s15 = scalar_lea.vmem %s1690_s14, 512  ;;  %p1692_p0 = scmp.lt.s32.totalorder %s1965_s18, %s1690_s14 }
  0x5b   : > { %p1687_p4 = pnand %p1685_p2, %p1671_p1  ;;  %p1693_p5 = scmp.lt.s32.totalorder %s1691_s15, %s1684_s26 }
  0x5d   : > { %p1688_p7 = pneg %p1687_p4  ;;  %p1694_p11 = por %p1693_p5, %p1692_p0 }
  0x5f   : > { %p1695_p12 = pnand %p1694_p11, %p1688_p7 }
  0x61   : > { %1698 = shalt.err (!%p1695_p12)
}
  0x62   : > { %s1778_s19 = smov 256   ;;  %s2591_s16 = smov 128  }
  0x63   : > { %1552 = dma.hbm_to_vmem [thread:$0]  (!%p2590_p10), %s1963_s7, 256, %s1965_s18, %s1967_s30, %s1778_s19, %s2591_s16, %s1776_s17  }
  0x64   : > { %p2592_p1 = scmp.ne.s32.totalorder %s2585_s11, 0 }
  0x65   : > { %s2000_s29 = sand.u32 (!%p2592_p1), 1, %s1763_s22   ;;  %p2593_p6 = scmp.ne.s32.totalorder (!%p2592_p1), %s2582_s8, 0 }
  0x66   : > { %254 = sbr.rel (%p2592_p1) target bundleno = 729 (0x2d9), region = 40  ;;  %s1415_s12 = sshll.u32 (!%p2592_p1), %s2000_s29, 4 }
  0x67   : > { %s257_s13 = scalar_lea.sflag (!%p2592_p1), [#allocation4], %s2000_s29  ;;  %s2004_s26 = scalar_lea.vmem (!%p2592_p1), [#allocation3], %s1415_s12 }
  0x6d   : > { %1742 = dma.done.wait (%p2593_p6), %s257_s13, 256  }
  0x6e   : > { %1744 = vsyncadd (%p2593_p6), %s257_s13, 4294967040  ;;  %p2594_p10 = scmp.eq.s32.totalorder %s1846_s25, 0 }
  0x70   : > { %1746 = dma.done.wait (%p2594_p10), [#allocation7], 768   ;;  %p2595_p13 = pmov %p2594_p10 }
  0x71   : > { %s1418_s11 = sshll.u32 %s2000_s29, 8  ;;  %p2596_p3 = scmp.ne.s32.totalorder %s1846_s25, 0 }
  0x72   : > { %1748 = vsyncadd (%p2595_p13), [#allocation7], 4294966528  ;;  %s2015_s17 = scalar_lea.vmem [#allocation10], %s1418_s11  ;;  %vm302_vm0 = vcmask (!%p2596_p3), 261120   ;;  %v1779_v0 = vmov (!%p2596_p3), 0.0  }
  0x73   : > { %301 = sbr.rel (%p2596_p3) target bundleno = 122 (0x7a), region = 56  ;;  %303 = vst.msk [vmem:[#allocation2] sm:$0xff] (!%p2596_p3), %vm302_vm0, %v1779_v0  ;;  %304 = vst.msk [vmem:[#allocation2 + $0x8] sm:$0xff] (!%p2596_p3), %vm302_vm0, %v1779_v0 }
  0x74   : > { %305 = vst.msk [vmem:[#allocation2 + $0x10] sm:$0xff] (!%p2596_p3), %vm302_vm0, %v1779_v0  ;;  %306 = vst.msk [vmem:[#allocation2 + $0x18] sm:$0xff] (!%p2596_p3), %vm302_vm0, %v1779_v0 }
  0x7a PF: > { %v309_v1 = vld [vmem:[#allocation6] sm:$0xff]  ;;  %v310_v2 = vld [vmem:[#allocation6 + $0x8] sm:$0xff]  ;;  %v311_v3 = vld [vmem:[#allocation6 + $0x10] sm:$0xff]  ;;  %vm320_vm1 = vcmask 261120   ;;  %s1780_s8 = smov 32   ;;  %v408_v11 = vlaneseq  ;;  %s1781_s18 = smov 96  }
  0x7b   : > { %v1512_v4 = vpack.c.bf16 %v310_v2, %v309_v1  ;;  %v312_v5 = vld [vmem:[#allocation6 + $0x18] sm:$0xff]  ;;  %v2020_v6 = vld [vmem:[%s2004_s26] sm:$0xff]  ;;  %v403_v9 = vld [vmem:[#allocation8 + $0x8] sm:$0xff]  ;;  %p1483_p8 = scmp.ne.s32.totalorder %s1846_s25, 1 }
  0x7c   : > { %v1516_v7 = vpack.c.bf16 %v312_v5, %v311_v3  ;;  %1509 = vmatprep.mubr.msk.f32.mxu0 %vm320_vm1, %v2020_v6  ;;  %v402_v8 = vld [vmem:[#allocation8] sm:$0xff]  ;;  %v2025_v10 = vld [vmem:[%s2004_s26 + $0x8] sm:$0xff]  ;;  %v409_v12 = vshrl.u32 %v408_v11, 7  ;;  %vm1230_vm2 = vcmask (!%p1483_p8), 1041409   ;;  %vm1245_vm3 = vcmask (!%p1483_p8), 254976  }
  0x7d   : > { %1513 = vmatprep.subr.bf16.mxu0 %v1512_v4  ;;  %418 = vrot.lane.b32.xlu0 %v402_v8, %s1780_s8  ;;  %v1420_v13 = vld [vmem:[%s2568_s2] ss:$0 sm:$0xff] }
  0x7e   : > { %1515 = vmatpush3.bf16.msra.mxu0 %v1512_v4  ;;  %v2032_v14 = vsub.s32 0, %v409_v12  ;;  %v2037_v19 = vsub.s32 1, %v409_v12  ;;  %v2044_v21 = vsub.s32 2, %v409_v12  ;;  %v2051_v23 = vsub.s32 3, %v409_v12 }
  0x7f   : > { %1517 = vmatprep.subr.bf16.mxu0 %v1516_v7  ;;  %v2058_v25 = vsub.s32 4, %v409_v12  ;;  %v2065_v27 = vsub.s32 5, %v409_v12  ;;  %v2072_v29 = vsub.s32 6, %v409_v12  ;;  %v2079_v31 = vsub.s32 7, %v409_v12 }
  0x81   : > { %420 = vrot.lane.b32.xlu0 %v403_v9, %s1780_s8 }
  0x82   : > { %1519 = vmatpush3.bf16.msra.mxu0 %v1516_v7 }
  0x85   : > { %1510 = vmatmul.mubr.msk.f32.vlgmr.msra.gmra.mrb[0].mxu0 %vm320_vm1, %v2025_v10 }
  0xef   : > { %v2126_v42 = vpop.permute.xlu0 %418 }
  0xf3   : > { %v2134_v45 = vpop.permute.xlu0 %420 }
 0x158   : > { %v1511_v15 = vpop.f32.mrb[0].mxu0 }
 0x159   : > { %v399_v16 = vadd.f32 %v1511_v15, %v1420_v13  ;;  %v393_v17 = vpop.f32.mrb[1].mxu0 }
 0x15a   : > { %v394_v32 = vadd.f32 %v1420_v13, %v393_v17 }
 0x15b   : > { %v2035_v18 = vrot.slane %v399_v16, %v2032_v14  ;;  %v2042_v20 = vrot.slane %v399_v16, %v2037_v19  ;;  %v2049_v22 = vrot.slane %v399_v16, %v2044_v21  ;;  %v2056_v24 = vrot.slane %v399_v16, %v2051_v23 }
 0x15c   : > { %v2063_v26 = vrot.slane %v399_v16, %v2058_v25  ;;  %v2070_v28 = vrot.slane %v399_v16, %v2065_v27  ;;  %v2077_v30 = vrot.slane %v399_v16, %v2072_v29  ;;  %v2084_v33 = vrot.slane %v399_v16, %v2079_v31 }
 0x15d   : > { %440 = vbcast.lane.b32.xlu1 %v2035_v18, 264  ;;  %436 = vbcast.lane.b32.xlu0 %v2035_v18, 256  ;;  %v2089_v34 = vrot.slane %v394_v32, %v2037_v19  ;;  %v2092_v35 = vrot.slane %v394_v32, %v2032_v14  ;;  %v2097_v36 = vrot.slane %v394_v32, %v2044_v21 }
 0x15e   : > { %v2102_v37 = vrot.slane %v394_v32, %v2051_v23  ;;  %v2107_v38 = vrot.slane %v394_v32, %v2058_v25  ;;  %v2112_v39 = vrot.slane %v394_v32, %v2065_v27  ;;  %v2117_v40 = vrot.slane %v394_v32, %v2072_v29 }
 0x15f   : > { %v2122_v41 = vrot.slane %v394_v32, %v2079_v31  ;;  %v426_v43 = vmul.f32 %v2126_v42, %v2035_v18  ;;  %v520_v44 = vmul.f32 %v2042_v20, %v2126_v42  ;;  %v615_v46 = vmul.f32 %v2049_v22, %v2126_v42 }
 0x160   : > { %v427_v47 = vmul.f32 %v2134_v45, %v2035_v18  ;;  %v710_v48 = vmul.f32 %v2056_v24, %v2126_v42  ;;  %v521_v49 = vmul.f32 %v2042_v20, %v2134_v45  ;;  %v805_v50 = vmul.f32 %v2063_v26, %v2126_v42 }
 0x161   : > { %534 = vbcast.lane.b32.xlu1 %v2042_v20, 264  ;;  %530 = vbcast.lane.b32.xlu0 %v2042_v20, 256  ;;  %v616_v51 = vmul.f32 %v2049_v22, %v2134_v45  ;;  %v900_v52 = vmul.f32 %v2070_v28, %v2126_v42  ;;  %v711_v53 = vmul.f32 %v2056_v24, %v2134_v45 }
 0x162   : > { %v995_v54 = vmul.f32 %v2077_v30, %v2126_v42  ;;  %v806_v55 = vmul.f32 %v2063_v26, %v2134_v45  ;;  %v901_v56 = vmul.f32 %v2070_v28, %v2134_v45  ;;  %v424_v57 = vmul.f32 %v2126_v42, %v2092_v35 }
 0x163   : > { %v996_v58 = vmul.f32 %v2077_v30, %v2134_v45  ;;  %v518_v59 = vmul.f32 %v2089_v34, %v2126_v42  ;;  %v425_v60 = vmul.f32 %v2134_v45, %v2092_v35  ;;  %v613_v61 = vmul.f32 %v2097_v36, %v2126_v42 }
 0x164   : > { %v519_v62 = vmul.f32 %v2089_v34, %v2134_v45  ;;  %v708_v63 = vmul.f32 %v2102_v37, %v2126_v42  ;;  %v614_v0 = vmul.f32 %v2097_v36, %v2134_v45  ;;  %v803_v1 = vmul.f32 %v2107_v38, %v2126_v42 }
 0x165   : > { %625 = vbcast.lane.b32.xlu1 %v2049_v22, 256  ;;  %629 = vbcast.lane.b32.xlu0 %v2049_v22, 264  ;;  %v709_v2 = vmul.f32 %v2102_v37, %v2134_v45  ;;  %v898_v3 = vmul.f32 %v2112_v39, %v2126_v42  ;;  %v804_v4 = vmul.f32 %v2107_v38, %v2134_v45 }
 0x166   : > { %v993_v5 = vmul.f32 %v2117_v40, %v2126_v42  ;;  %v899_v9 = vmul.f32 %v2112_v39, %v2134_v45  ;;  %v994_v15 = vmul.f32 %v2117_v40, %v2134_v45 }
 0x169   : > { %720 = vbcast.lane.b32.xlu1 %v2056_v24, 256  ;;  %724 = vbcast.lane.b32.xlu0 %v2056_v24, 264 }
 0x16d   : > { %815 = vbcast.lane.b32.xlu1 %v2063_v26, 256  ;;  %819 = vbcast.lane.b32.xlu0 %v2063_v26, 264 }
 0x171   : > { %910 = vbcast.lane.b32.xlu1 %v2070_v28, 256  ;;  %914 = vbcast.lane.b32.xlu0 %v2070_v28, 264 }
 0x175   : > { %1005 = vbcast.lane.b32.xlu1 %v2077_v30, 256  ;;  %1009 = vbcast.lane.b32.xlu0 %v2077_v30, 264 }
 0x179   : > { %1100 = vbcast.lane.b32.xlu1 %v2084_v33, 256  ;;  %1104 = vbcast.lane.b32.xlu0 %v2084_v33, 264 }
 0x17d   : > { %523 = vbcast.lane.b32.xlu0 %v2089_v34, 256  ;;  %429 = vbcast.lane.b32.xlu1 %v2092_v35, 256 }
 0x181   : > { %622 = vbcast.lane.b32.xlu0 %v2097_v36, 264  ;;  %433 = vbcast.lane.b32.xlu1 %v2092_v35, 264 }
 0x185   : > { %717 = vbcast.lane.b32.xlu0 %v2102_v37, 264  ;;  %527 = vbcast.lane.b32.xlu1 %v2089_v34, 264 }
 0x189   : > { %812 = vbcast.lane.b32.xlu0 %v2107_v38, 264  ;;  %618 = vbcast.lane.b32.xlu1 %v2097_v36, 256 }
 0x18d   : > { %907 = vbcast.lane.b32.xlu0 %v2112_v39, 264  ;;  %713 = vbcast.lane.b32.xlu1 %v2102_v37, 256 }
 0x191   : > { %1002 = vbcast.lane.b32.xlu0 %v2117_v40, 264  ;;  %808 = vbcast.lane.b32.xlu1 %v2107_v38, 256 }
 0x195   : > { %1097 = vbcast.lane.b32.xlu0 %v2122_v41, 264  ;;  %903 = vbcast.lane.b32.xlu1 %v2112_v39, 256 }
 0x199   : > { %454 = vrot.lane.b32.xlu0 %v426_v43, %s1781_s18  ;;  %998 = vbcast.lane.b32.xlu1 %v2117_v40, 256 }
 0x19d   : > { %548 = vrot.lane.b32.xlu0 %v520_v44, %s1781_s18  ;;  %1093 = vbcast.lane.b32.xlu1 %v2122_v41, 256 }
 0x1a1   : > { %643 = vrot.lane.b32.xlu0 %v615_v46, %s1781_s18  ;;  %456 = vrot.lane.b32.xlu1 %v427_v47, %s1781_s18 }
 0x1a5   : > { %738 = vrot.lane.b32.xlu0 %v710_v48, %s1781_s18  ;;  %550 = vrot.lane.b32.xlu1 %v521_v49, %s1781_s18 }
 0x1a9   : > { %833 = vrot.lane.b32.xlu0 %v805_v50, %s1781_s18  ;;  %645 = vrot.lane.b32.xlu1 %v616_v51, %s1781_s18 }
 0x1ad   : > { %928 = vrot.lane.b32.xlu0 %v900_v52, %s1781_s18  ;;  %740 = vrot.lane.b32.xlu1 %v711_v53, %s1781_s18 }
 0x1b1   : > { %1023 = vrot.lane.b32.xlu0 %v995_v54, %s1781_s18  ;;  %835 = vrot.lane.b32.xlu1 %v806_v55, %s1781_s18 }
 0x1b5   : > { %930 = vrot.lane.b32.xlu1 %v901_v56, %s1781_s18  ;;  %450 = vrot.lane.b32.xlu0 %v424_v57, %s1781_s18 }
 0x1b9   : > { %1025 = vrot.lane.b32.xlu1 %v996_v58, %s1781_s18  ;;  %544 = vrot.lane.b32.xlu0 %v518_v59, %s1781_s18 }
 0x1bd   : > { %452 = vrot.lane.b32.xlu1 %v425_v60, %s1781_s18  ;;  %639 = vrot.lane.b32.xlu0 %v613_v61, %s1781_s18 }
 0x1c1   : > { %546 = vrot.lane.b32.xlu1 %v519_v62, %s1781_s18  ;;  %734 = vrot.lane.b32.xlu0 %v708_v63, %s1781_s18 }
 0x1c5   : > { %641 = vrot.lane.b32.xlu1 %v614_v0, %s1781_s18  ;;  %829 = vrot.lane.b32.xlu0 %v803_v1, %s1781_s18 }
 0x1c9   : > { %736 = vrot.lane.b32.xlu1 %v709_v2, %s1781_s18  ;;  %924 = vrot.lane.b32.xlu0 %v898_v3, %s1781_s18 }
 0x1cd   : > { %831 = vrot.lane.b32.xlu1 %v804_v4, %s1781_s18  ;;  %1019 = vrot.lane.b32.xlu0 %v993_v5, %s1781_s18 }
 0x1cf   : > { %v441_v7 = vpop.permute.xlu1 %440  ;;  %v437_v8 = vpop.permute.xlu0 %436 }
 0x1d0   : > { %v444_v11 = vmul.f32 %v437_v8, %v2035_v18  ;;  %v445_v17 = vmul.f32 %v441_v7, %v2035_v18 }
 0x1d1   : > { %926 = vrot.lane.b32.xlu1 %v899_v9, %s1781_s18 }
 0x1d2   : > { %482 = vrot.lane.b32.xlu0 %v444_v11, %s1781_s18 }
 0x1d3   : > { %v535_v12 = vpop.permute.xlu1 %534  ;;  %v531_v13 = vpop.permute.xlu0 %530 }
 0x1d4   : > { %v538_v16 = vmul.f32 %v531_v13, %v2042_v20  ;;  %v539_v46 = vmul.f32 %v535_v12, %v2042_v20  ;;  %v1088_v12 = vmul.f32 %v2122_v41, %v2126_v42 }
 0x1d5   : > { %1021 = vrot.lane.b32.xlu1 %v994_v15, %s1781_s18 }
 0x1d6   : > { %576 = vrot.lane.b32.xlu0 %v538_v16, %s1781_s18  ;;  %v1089_v16 = vmul.f32 %v2122_v41, %v2134_v45 }
 0x1d7   : > { %v626_v32 = vpop.permute.xlu1 %625  ;;  %v630_v43 = vpop.permute.xlu0 %629 }
 0x1d8   : > { %v633_v44 = vmul.f32 %v626_v32, %v2049_v22  ;;  %v634_v18 = vmul.f32 %v630_v43, %v2049_v22 }
 0x1d9   : > { %484 = vrot.lane.b32.xlu1 %v445_v17, %s1781_s18 }
 0x1da   : > { %671 = vrot.lane.b32.xlu0 %v633_v44, %s1781_s18 }
 0x1db   : > { %v721_v47 = vpop.permute.xlu1 %720  ;;  %v725_v48 = vpop.permute.xlu0 %724 }
 0x1dc   : > { %v728_v49 = vmul.f32 %v721_v47, %v2056_v24  ;;  %v729_v20 = vmul.f32 %v725_v48, %v2056_v24  ;;  %v1090_v48 = vmul.f32 %v2084_v33, %v2126_v42 }
 0x1dd   : > { %578 = vrot.lane.b32.xlu1 %v539_v46, %s1781_s18 }
 0x1de   : > { %766 = vrot.lane.b32.xlu0 %v728_v49, %s1781_s18 }
 0x1df   : > { %v816_v50 = vpop.permute.xlu1 %815  ;;  %v820_v51 = vpop.permute.xlu0 %819 }
 0x1e0   : > { %v823_v52 = vmul.f32 %v816_v50, %v2063_v26  ;;  %v824_v22 = vmul.f32 %v820_v51, %v2063_v26  ;;  %v1091_v50 = vmul.f32 %v2084_v33, %v2134_v45 }
 0x1e1   : > { %673 = vrot.lane.b32.xlu1 %v634_v18, %s1781_s18 }
 0x1e2   : > { %861 = vrot.lane.b32.xlu0 %v823_v52, %s1781_s18 }
 0x1e3   : > { %v911_v53 = vpop.permute.xlu1 %910  ;;  %v915_v54 = vpop.permute.xlu0 %914 }
 0x1e4   : > { %v918_v55 = vmul.f32 %v911_v53, %v2070_v28  ;;  %v919_v58 = vmul.f32 %v915_v54, %v2070_v28 }
 0x1e5   : > { %768 = vrot.lane.b32.xlu1 %v729_v20, %s1781_s18 }
 0x1e6   : > { %956 = vrot.lane.b32.xlu0 %v918_v55, %s1781_s18 }
 0x1e7   : > { %v1006_v56 = vpop.permute.xlu1 %1005  ;;  %v1010_v57 = vpop.permute.xlu0 %1009 }
 0x1e8   : > { %v1013_v0 = vmul.f32 %v1006_v56, %v2077_v30  ;;  %v1014_v3 = vmul.f32 %v1010_v57, %v2077_v30 }
 0x1e9   : > { %863 = vrot.lane.b32.xlu1 %v824_v22, %s1781_s18 }
 0x1eb   : > { %v2239_v59 = vpop.permute.xlu1 %1100  ;;  %v2241_v60 = vpop.permute.xlu0 %1104 }
 0x1ec   : > { %v1108_v22 = vmul.f32 %v2239_v59, %v2084_v33 }
 0x1ed   : > { %958 = vrot.lane.b32.xlu1 %v919_v58, %s1781_s18  ;;  %v1109_v58 = vmul.f32 %v2241_v60, %v2084_v33 }
 0x1ef   : > { %v524_v24 = vpop.permute.xlu0 %523  ;;  %v430_v61 = vpop.permute.xlu1 %429 }
 0x1f0   : > { %v442_v62 = vmul.f32 %v430_v61, %v2092_v35  ;;  %v536_v4 = vmul.f32 %v524_v24, %v2089_v34 }
 0x1f2   : > { %478 = vrot.lane.b32.xlu0 %v442_v62, %s1781_s18 }
 0x1f3   : > { %v623_v63 = vpop.permute.xlu0 %622  ;;  %v434_v26 = vpop.permute.xlu1 %433 }
 0x1f4   : > { %v443_v1 = vmul.f32 %v434_v26, %v2092_v35  ;;  %v632_v30 = vmul.f32 %v623_v63, %v2097_v36 }
 0x1f6   : > { %480 = vrot.lane.b32.xlu1 %v443_v1, %s1781_s18  ;;  %1051 = vrot.lane.b32.xlu0 %v1013_v0, %s1781_s18 }
 0x1f7   : > { %v718_v28 = vpop.permute.xlu0 %717  ;;  %v528_v2 = vpop.permute.xlu1 %527 }
 0x1f8   : > { %v537_v8 = vmul.f32 %v528_v2, %v2089_v34  ;;  %v727_v32 = vmul.f32 %v718_v28, %v2102_v37 }
 0x1fa   : > { %1053 = vrot.lane.b32.xlu1 %v1014_v3, %s1781_s18  ;;  %572 = vrot.lane.b32.xlu0 %v536_v4, %s1781_s18 }
 0x1fb   : > { %v813_v5 = vpop.permute.xlu0 %812  ;;  %v619_v7 = vpop.permute.xlu1 %618 }
 0x1fc   : > { %v631_v35 = vmul.f32 %v619_v7, %v2097_v36  ;;  %v822_v47 = vmul.f32 %v813_v5, %v2107_v38 }
 0x1fe   : > { %574 = vrot.lane.b32.xlu1 %v537_v8, %s1781_s18  ;;  %667 = vrot.lane.b32.xlu0 %v631_v35, %s1781_s18  ;;  %v473_v35 = vrot.slane %v2025_v10, %v2032_v14 }
 0x1ff   : > { %v908_v9 = vpop.permute.xlu0 %907  ;;  %v714_v11 = vpop.permute.xlu1 %713 }
 0x200   : > { %v726_v34 = vmul.f32 %v714_v11, %v2102_v37  ;;  %v917_v42 = vmul.f32 %v908_v9, %v2112_v39  ;;  %v406_v9 = vld [vmem:[#allocation2 + $0x10] sm:$0xff] }
 0x202   : > { %669 = vrot.lane.b32.xlu1 %v632_v30, %s1781_s18  ;;  %1114 = vrot.lane.b32.xlu0 %v1088_v12, %s1781_s18 }
 0x203   : > { %v1003_v13 = vpop.permute.xlu0 %1002  ;;  %v809_v15 = vpop.permute.xlu1 %808 }
 0x204   : > { %v821_v43 = vmul.f32 %v809_v15, %v2107_v38  ;;  %v1012_v45 = vmul.f32 %v1003_v13, %v2117_v40 }
 0x206   : > { %1116 = vrot.lane.b32.xlu1 %v1089_v16, %s1781_s18  ;;  %762 = vrot.lane.b32.xlu0 %v726_v34, %s1781_s18  ;;  %v567_v16 = vrot.slane %v2025_v10, %v2037_v19 }
 0x207   : > { %v1098_v17 = vpop.permute.xlu0 %1097  ;;  %v904_v36 = vpop.permute.xlu1 %903 }
 0x208   : > { %v916_v37 = vmul.f32 %v904_v36, %v2112_v39  ;;  %v1107_v56 = vmul.f32 %v1098_v17, %v2122_v41  ;;  %v407_v36 = vld [vmem:[#allocation2 + $0x18] sm:$0xff] }
 0x20a   : > { %764 = vrot.lane.b32.xlu1 %v727_v32, %s1781_s18  ;;  %857 = vrot.lane.b32.xlu0 %v821_v43, %s1781_s18 }
 0x20b   : > { %v455_v44 = vpop.permute.xlu0 %454  ;;  %v999_v46 = vpop.permute.xlu1 %998 }
 0x20c   : > { %v1011_v52 = vmul.f32 %v999_v46, %v2117_v40  ;;  %v464_v12 = vmul.f32 %v455_v44, %v406_v9 }
 0x20e   : > { %859 = vrot.lane.b32.xlu1 %v822_v47, %s1781_s18  ;;  %1118 = vrot.lane.b32.xlu0 %v1090_v48, %s1781_s18 }
 0x20f   : > { %v549_v49 = vpop.permute.xlu0 %548  ;;  %v1094_v18 = vpop.permute.xlu1 %1093 }
 0x210   : > { %v1106_v54 = vmul.f32 %v1094_v18, %v2122_v41 }
 0x212   : > { %1120 = vrot.lane.b32.xlu1 %v1091_v50, %s1781_s18  ;;  %952 = vrot.lane.b32.xlu0 %v916_v37, %s1781_s18  ;;  %v662_v37 = vrot.slane %v2025_v10, %v2044_v21 }
 0x213   : > { %v2282_v51 = vpop.permute.xlu0 %643  ;;  %v457_v38 = vpop.permute.xlu1 %456 }
 0x214   : > { %v465_v48 = vmul.f32 %v457_v38, %v407_v36 }
 0x216   : > { %954 = vrot.lane.b32.xlu1 %v917_v42, %s1781_s18  ;;  %1047 = vrot.lane.b32.xlu0 %v1011_v52, %s1781_s18 }
 0x217   : > { %v2288_v20 = vpop.permute.xlu0 %738  ;;  %v551_v53 = vpop.permute.xlu1 %550 }
 0x21a   : > { %1049 = vrot.lane.b32.xlu1 %v1012_v45, %s1781_s18  ;;  %1142 = vrot.lane.b32.xlu0 %v1106_v54, %s1781_s18 }
 0x21b   : > { %v2294_v55 = vpop.permute.xlu0 %833  ;;  %v2296_v39 = vpop.permute.xlu1 %645 }
 0x21e   : > { %1144 = vrot.lane.b32.xlu1 %v1107_v56, %s1781_s18  ;;  %1146 = vrot.lane.b32.xlu0 %v1108_v22, %s1781_s18 }
 0x21f   : > { %v2303_v40 = vpop.permute.xlu0 %928  ;;  %v2305_v57 = vpop.permute.xlu1 %740 }
 0x222   : > { %1148 = vrot.lane.b32.xlu1 %v1109_v58, %s1781_s18  ;;  %1193 = vbcast.lane.b32.xlu0 (!%p1483_p8), %v2084_v33, 272 }
 0x223   : > { %v2310_v24 = vpop.permute.xlu0 %1023  ;;  %v2312_v61 = vpop.permute.xlu1 %835 }
 0x226   : > { %1185 = vbcast.lane.b32.xlu1 (!%p1483_p8), %v2122_v41, 272  ;;  %1197 = vbcast.lane.b32.xlu0 (!%p1483_p8), %v2084_v33, 280 }
 0x227   : > { %v2314_v59 = vpop.permute.xlu1 %930  ;;  %v2316_v62 = vpop.permute.xlu0 %450 }
 0x22a   : > { %1189 = vbcast.lane.b32.xlu1 (!%p1483_p8), %v2122_v41, 280 }
 0x22b   : > { %v2318_v63 = vpop.permute.xlu1 %1025  ;;  %v2320_v26 = vpop.permute.xlu0 %544 }
 0x22f   : > { %v2322_v0 = vpop.permute.xlu1 %452  ;;  %v2324_v1 = vpop.permute.xlu0 %639 }
 0x233   : > { %v2326_v28 = vpop.permute.xlu1 %546  ;;  %v2328_v60 = vpop.permute.xlu0 %734 }
 0x237   : > { %v2330_v2 = vpop.permute.xlu1 %641  ;;  %v2332_v3 = vpop.permute.xlu0 %829 }
 0x23b   : > { %v2334_v4 = vpop.permute.xlu1 %736  ;;  %v2336_v5 = vpop.permute.xlu0 %924 }
 0x23f   : > { %v2338_v7 = vpop.permute.xlu1 %831  ;;  %v2340_v8 = vpop.permute.xlu0 %1019 }
 0x243   : > { %v2344_v11 = vpop.permute.xlu1 %926 }
 0x244   : > { %v483_v30 = vpop.permute.xlu0 %482 }
 0x245   : > { %v492_v13 = vmul.f32 %v483_v30, %v473_v35 }
 0x247   : > { %v496_v15 = vadd.f32 %v492_v13, %v464_v12  ;;  %v2346_v34 = vpop.permute.xlu1 %1021 }
 0x248   : > { %v577_v17 = vpop.permute.xlu0 %576 }
 0x249   : > { %v1425_v32 = vclamps-f32 %v496_v15, 1000000.0  ;;  %v586_v46 = vmul.f32 %v577_v17, %v567_v16 }
 0x24b   : > { %508 = vst.msk [vmem:[%s2015_s17 + $0x80] sm:$0xff] %vm320_vm1, %v1425_v32  ;;  %v558_v43 = vmul.f32 %v1425_v32, %v549_v49  ;;  %v485_v47 = vpop.permute.xlu1 %484 }
 0x24c   : > { %v493_v18 = vmul.f32 %v485_v47, %v473_v35  ;;  %v672_v42 = vpop.permute.xlu0 %671  ;;  %v757_v35 = vrot.slane %v2025_v10, %v2051_v23 }
 0x24d   : > { %v590_v44 = vadd.f32 %v586_v46, %v558_v43  ;;  %v681_v49 = vmul.f32 %v672_v42, %v662_v37  ;;  %v852_v43 = vrot.slane %v2025_v10, %v2058_v25 }
 0x24e   : > { %v497_v50 = vadd.f32 %v493_v18, %v465_v48 }
 0x24f   : > { %v1429_v52 = vclamps-f32 %v590_v44, 1000000.0  ;;  %v579_v45 = vpop.permute.xlu1 %578 }
 0x250   : > { %v1426_v54 = vclamps-f32 %v497_v50, 1000000.0  ;;  %v587_v56 = vmul.f32 %v579_v45, %v567_v16  ;;  %v767_v12 = vpop.permute.xlu0 %766 }
 0x251   : > { %1433 = vst.msk [vmem:[%s2015_s17 + $0x90] sm:$0xff] %vm320_vm1, %v1429_v52  ;;  %v653_v22 = vmul.f32 %v1429_v52, %v2282_v51  ;;  %v776_v17 = vmul.f32 %v767_v12, %v757_v35  ;;  %v947_v52 = vrot.slane %v2025_v10, %v2065_v27 }
 0x252   : > { %509 = vst.msk [vmem:[%s2015_s17 + $0x88] sm:$0xff] %vm320_vm1, %v1426_v54  ;;  %v559_v38 = vmul.f32 %v1426_v54, %v551_v53 }
 0x253   : > { %v685_v58 = vadd.f32 %v681_v49, %v653_v22  ;;  %v674_v9 = vpop.permute.xlu1 %673  ;;  %v469_v49 = vrot.slane %v2020_v6, %v2032_v14 }
 0x254   : > { %v591_v30 = vadd.f32 %v587_v56, %v559_v38  ;;  %v682_v16 = vmul.f32 %v674_v9, %v662_v37  ;;  %v862_v47 = vpop.permute.xlu0 %861  ;;  %v404_v38 = vld [vmem:[#allocation2] sm:$0xff] }
 0x255   : > { %v1437_v13 = vclamps-f32 %v685_v58, 1000000.0  ;;  %v871_v44 = vmul.f32 %v862_v47, %v852_v43  ;;  %v462_v12 = vmul.f32 %v2316_v62, %v404_v38 }
 0x256   : > { %v1430_v15 = vclamps-f32 %v591_v30, 1000000.0 }
 0x257   : > { %1441 = vst.msk [vmem:[%s2015_s17 + $0xa0] sm:$0xff] %vm320_vm1, %v1437_v13  ;;  %v748_v51 = vmul.f32 %v1437_v13, %v2288_v20  ;;  %v769_v36 = vpop.permute.xlu1 %768  ;;  %v405_v13 = vld [vmem:[#allocation2 + $0x8] sm:$0xff] }
 0x258   : > { %1434 = vst.msk [vmem:[%s2015_s17 + $0x98] sm:$0xff] %vm320_vm1, %v1430_v15  ;;  %v654_v53 = vmul.f32 %v1430_v15, %v2296_v39  ;;  %v777_v37 = vmul.f32 %v769_v36, %v757_v35  ;;  %v957_v54 = vpop.permute.xlu0 %956 }
 0x259   : > { %v780_v32 = vadd.f32 %v776_v17, %v748_v51  ;;  %v966_v58 = vmul.f32 %v957_v54, %v947_v52  ;;  %v1042_v51 = vrot.slane %v2025_v10, %v2072_v29 }
 0x25a   : > { %v686_v46 = vadd.f32 %v682_v16, %v654_v53  ;;  %v463_v16 = vmul.f32 %v2322_v0, %v405_v13 }
 0x25b   : > { %v1445_v48 = vclamps-f32 %v780_v32, 1000000.0  ;;  %v864_v50 = vpop.permute.xlu1 %863 }
 0x25c   : > { %v1438_v18 = vclamps-f32 %v686_v46, 1000000.0  ;;  %v872_v35 = vmul.f32 %v864_v50, %v852_v43  ;;  %v563_v43 = vrot.slane %v2020_v6, %v2037_v19 }
 0x25d   : > { %1449 = vst.msk [vmem:[%s2015_s17 + $0xb0] sm:$0xff] %vm320_vm1, %v1445_v48  ;;  %v843_v20 = vmul.f32 %v1445_v48, %v2294_v55 }
 0x25e   : > { %1442 = vst.msk [vmem:[%s2015_s17 + $0xa8] sm:$0xff] %vm320_vm1, %v1438_v18  ;;  %v749_v39 = vmul.f32 %v1438_v18, %v2305_v57 }
 0x25f   : > { %v875_v42 = vadd.f32 %v871_v44, %v843_v20  ;;  %v959_v9 = vpop.permute.xlu1 %958 }
 0x260   : > { %v781_v45 = vadd.f32 %v777_v37, %v749_v39  ;;  %v967_v0 = vmul.f32 %v959_v9, %v947_v52  ;;  %v658_v52 = vrot.slane %v2020_v6, %v2044_v21 }
 0x261   : > { %v1453_v22 = vclamps-f32 %v875_v42, 1000000.0 }
 0x262   : > { %v1446_v55 = vclamps-f32 %v781_v45, 1000000.0 }
 0x263   : > { %1457 = vst.msk [vmem:[%s2015_s17 + $0xc0] sm:$0xff] %vm320_vm1, %v1453_v22  ;;  %v938_v56 = vmul.f32 %v1453_v22, %v2303_v40 }
 0x264   : > { %1450 = vst.msk [vmem:[%s2015_s17 + $0xb8] sm:$0xff] %vm320_vm1, %v1446_v55  ;;  %v844_v57 = vmul.f32 %v1446_v55, %v2312_v61  ;;  %v479_v30 = vpop.permute.xlu0 %478 }
 0x265   : > { %v970_v15 = vadd.f32 %v966_v58, %v938_v56  ;;  %v490_v14 = vmul.f32 %v479_v30, %v469_v49 }
 0x266   : > { %v876_v17 = vadd.f32 %v872_v35, %v844_v57 }
 0x267   : > { %v1461_v40 = vclamps-f32 %v970_v15, 1000000.0  ;;  %v494_v53 = vadd.f32 %v490_v14, %v462_v12 }
 0x268   : > { %v1454_v61 = vclamps-f32 %v876_v17, 1000000.0  ;;  %v481_v36 = vpop.permute.xlu1 %480  ;;  %v1052_v32 = vpop.permute.xlu0 %1051 }
 0x269   : > { %1465 = vst.msk [vmem:[%s2015_s17 + $0xd0] sm:$0xff] %vm320_vm1, %v1461_v40  ;;  %v1423_v62 = vclamps-f32 %v494_v53, 1000000.0  ;;  %v491_v46 = vmul.f32 %v481_v36, %v469_v49  ;;  %v1033_v47 = vmul.f32 %v1461_v40, %v2310_v24  ;;  %v1061_v48 = vmul.f32 %v1052_v32, %v1042_v51 }
 0x26a   : > { %1458 = vst.msk [vmem:[%s2015_s17 + $0xc8] sm:$0xff] %vm320_vm1, %v1454_v61  ;;  %v939_v18 = vmul.f32 %v1454_v61, %v2314_v59  ;;  %v848_v32 = vrot.slane %v2020_v6, %v2058_v25 }
 0x26b   : > { %506 = vst.msk [vmem:[%s2015_s17] sm:$0xff] %vm320_vm1, %v1423_v62  ;;  %v495_v20 = vadd.f32 %v491_v46, %v463_v16  ;;  %v2399_v44 = vadd.f32 %v1061_v48, %v1033_v47  ;;  %v556_v24 = vmul.f32 %v1423_v62, %v2320_v26 }
 0x26c   : > { %v971_v19 = vadd.f32 %v967_v0, %v939_v18  ;;  %v1054_v39 = vpop.permute.xlu1 %1053  ;;  %v573_v37 = vpop.permute.xlu0 %572 }
 0x26d   : > { %v1424_v50 = vclamps-f32 %v495_v20, 1000000.0  ;;  %v584_v42 = vmul.f32 %v573_v37, %v563_v43  ;;  %v1469_v45 = vclamps-f32 %v2399_v44, 1000000.0  ;;  %v1062_v26 = vmul.f32 %v1054_v39, %v1042_v51 }
 0x26e   : > { %v1462_v54 = vclamps-f32 %v971_v19, 1000000.0  ;;  %v943_v39 = vrot.slane %v2020_v6, %v2065_v27  ;;  %v1038_v27 = vrot.slane %v2020_v6, %v2072_v29 }
 0x26f   : > { %507 = vst.msk [vmem:[%s2015_s17 + $0x8] sm:$0xff] %vm320_vm1, %v1424_v50  ;;  %v588_v59 = vadd.f32 %v584_v42, %v556_v24  ;;  %1473 = vst.msk [vmem:[%s2015_s17 + $0xe0] sm:$0xff] %vm320_vm1, %v1469_v45  ;;  %v557_v56 = vmul.f32 %v1424_v50, %v2326_v28  ;;  %v753_v28 = vrot.slane %v2020_v6, %v2051_v23 }
 0x270   : > { %1466 = vst.msk [vmem:[%s2015_s17 + $0xd8] sm:$0xff] %vm320_vm1, %v1462_v54  ;;  %v1034_v22 = vmul.f32 %v1462_v54, %v2318_v63  ;;  %v575_v49 = vpop.permute.xlu1 %574  ;;  %v668_v38 = vpop.permute.xlu0 %667 }
 0x271   : > { %v1427_v55 = vclamps-f32 %v588_v59, 1000000.0  ;;  %v585_v58 = vmul.f32 %v575_v49, %v563_v43  ;;  %v679_v9 = vmul.f32 %v668_v38, %v658_v52 }
 0x272   : > { %v2415_v57 = vadd.f32 %v1062_v26, %v1034_v22 }
 0x273   : > { %1431 = vst.msk [vmem:[%s2015_s17 + $0x10] sm:$0xff] %vm320_vm1, %v1427_v55  ;;  %v589_v21 = vadd.f32 %v585_v58, %v557_v56  ;;  %v651_v35 = vmul.f32 %v1427_v55, %v2324_v1 }
 0x274   : > { %v670_v30 = vpop.permute.xlu1 %669  ;;  %v2420_v63 = vpop.permute.xlu0 %1114  ;;  %v1470_v12 = vclamps-f32 %v2415_v57, 1000000.0 }
 0x275   : > { %v1428_v13 = vclamps-f32 %v589_v21, 1000000.0  ;;  %v683_v15 = vadd.f32 %v679_v9, %v651_v35  ;;  %v680_v51 = vmul.f32 %v670_v30, %v658_v52  ;;  %v1133_v30 = vrot.slane %v2020_v6, %v2079_v31 }
 0x276   : > { %1474 = vst.msk [vmem:[%s2015_s17 + $0xe8] sm:$0xff] %vm320_vm1, %v1470_v12 }
 0x277   : > { %1432 = vst.msk [vmem:[%s2015_s17 + $0x18] sm:$0xff] %vm320_vm1, %v1428_v13  ;;  %v1435_v14 = vclamps-f32 %v683_v15, 1000000.0  ;;  %v652_v1 = vmul.f32 %v1428_v13, %v2330_v2  ;;  %v1137_v13 = vrot.slane %v2025_v10, %v2079_v31 }
 0x278   : > { %v2432_v17 = vpop.permute.xlu1 %1116  ;;  %v763_v40 = vpop.permute.xlu0 %762 }
 0x279   : > { %1439 = vst.msk [vmem:[%s2015_s17 + $0x20] sm:$0xff] %vm320_vm1, %v1435_v14  ;;  %v684_v53 = vadd.f32 %v680_v51, %v652_v1  ;;  %v746_v23 = vmul.f32 %v1435_v14, %v2328_v60  ;;  %v774_v16 = vmul.f32 %v763_v40, %v753_v28 }
 0x27b   : > { %v1436_v61 = vclamps-f32 %v684_v53, 1000000.0  ;;  %v778_v36 = vadd.f32 %v774_v16, %v746_v23 }
 0x27c   : > { %v765_v43 = vpop.permute.xlu1 %764  ;;  %v858_v62 = vpop.permute.xlu0 %857 }
 0x27d   : > { %1440 = vst.msk [vmem:[%s2015_s17 + $0x28] sm:$0xff] %vm320_vm1, %v1436_v61  ;;  %v1443_v2 = vclamps-f32 %v778_v36, 1000000.0  ;;  %v747_v46 = vmul.f32 %v1436_v61, %v2334_v4  ;;  %v775_v47 = vmul.f32 %v765_v43, %v753_v28  ;;  %v869_v18 = vmul.f32 %v858_v62, %v848_v32 }
 0x27f   : > { %1447 = vst.msk [vmem:[%s2015_s17 + $0x30] sm:$0xff] %vm320_vm1, %v1443_v2  ;;  %v779_v48 = vadd.f32 %v775_v47, %v747_v46  ;;  %v841_v60 = vmul.f32 %v1443_v2, %v2332_v3 }
 0x280   : > { %v860_v0 = vpop.permute.xlu1 %859  ;;  %v1119_v20 = vpop.permute.xlu0 %1118 }
 0x281   : > { %v1444_v19 = vclamps-f32 %v779_v48, 1000000.0  ;;  %v873_v25 = vadd.f32 %v869_v18, %v841_v60  ;;  %v870_v50 = vmul.f32 %v860_v0, %v848_v32 }
 0x283   : > { %1448 = vst.msk [vmem:[%s2015_s17 + $0x38] sm:$0xff] %vm320_vm1, %v1444_v19  ;;  %v1451_v37 = vclamps-f32 %v873_v25, 1000000.0  ;;  %v842_v4 = vmul.f32 %v1444_v19, %v2338_v7  ;;  %v1228_v19 = vrot.slane (!%p1483_p8), %v2020_v6, 7  ;;  %v1229_v25 = vrot.slane (!%p1483_p8), %v2025_v10, 6 }
 0x284   : > { %v1121_v24 = vpop.permute.xlu1 %1120  ;;  %v953_v42 = vpop.permute.xlu0 %952 }
 0x285   : > { %1455 = vst.msk [vmem:[%s2015_s17 + $0x40] sm:$0xff] %vm320_vm1, %v1451_v37  ;;  %v874_v3 = vadd.f32 %v870_v50, %v842_v4  ;;  %v936_v54 = vmul.f32 %v1451_v37, %v2336_v5  ;;  %v964_v59 = vmul.f32 %v953_v42, %v943_v39  ;;  %v1231_v6 = vsel (!%p1483_p8), %vm1230_vm2, %v1229_v25, %v1228_v19 }
 0x287   : > { %v1452_v52 = vclamps-f32 %v874_v3, 1000000.0  ;;  %v968_v22 = vadd.f32 %v964_v59, %v936_v54  ;;  %v1484_v3 = vld [vmem:[%s2570_s4] ss:$0 sm:$0xff] (!%p1483_p8) }
 0x288   : > { %v955_v26 = vpop.permute.xlu1 %954  ;;  %v1048_v49 = vpop.permute.xlu0 %1047 }
 0x289   : > { %1456 = vst.msk [vmem:[%s2015_s17 + $0x48] sm:$0xff] %vm320_vm1, %v1452_v52  ;;  %v1459_v7 = vclamps-f32 %v968_v22, 1000000.0  ;;  %v937_v38 = vmul.f32 %v1452_v52, %v2344_v11  ;;  %v965_v55 = vmul.f32 %v955_v26, %v943_v39  ;;  %v1059_v58 = vmul.f32 %v1048_v49, %v1038_v27 }
 0x28a   : > { %v1233_v52 = vmul.f32 (!%p1483_p8), %v1484_v3, %v1231_v6 }
 0x28b   : > { %1463 = vst.msk [vmem:[%s2015_s17 + $0x50] sm:$0xff] %vm320_vm1, %v1459_v7  ;;  %v969_v56 = vadd.f32 %v965_v55, %v937_v38  ;;  %v1031_v5 = vmul.f32 %v1459_v7, %v2340_v8  ;;  %v1128_v8 = vmul.f32 %v1469_v45, %v1119_v20 }
 0x28c   : > { %v1050_v21 = vpop.permute.xlu1 %1049  ;;  %v1143_v35 = vpop.permute.xlu0 %1142  ;;  %v1235_v38 = vrot.slane (!%p1483_p8), %v1233_v52, 1 }
 0x28d   : > { %v1460_v9 = vclamps-f32 %v969_v56, 1000000.0  ;;  %v1063_v29 = vadd.f32 %v1059_v58, %v1031_v5  ;;  %v1060_v28 = vmul.f32 %v1050_v21, %v1038_v27  ;;  %v1154_v53 = vmul.f32 %v1143_v35, %v1133_v30 }
 0x28f   : > { %1464 = vst.msk [vmem:[%s2015_s17 + $0x58] sm:$0xff] %vm320_vm1, %v1460_v9  ;;  %v1467_v11 = vclamps-f32 %v1063_v29, 1000000.0  ;;  %v1032_v15 = vmul.f32 %v1460_v9, %v2346_v34  ;;  %v1129_v34 = vmul.f32 %v1470_v12, %v1121_v24 }
 0x290   : > { %v1145_v14 = vpop.permute.xlu1 %1144  ;;  %v1147_v1 = vpop.permute.xlu0 %1146 }
 0x291   : > { %1471 = vst.msk [vmem:[%s2015_s17 + $0x60] sm:$0xff] %vm320_vm1, %v1467_v11  ;;  %v1064_v51 = vadd.f32 %v1060_v28, %v1032_v15  ;;  %v1126_v40 = vmul.f32 %v1467_v11, %v2420_v63  ;;  %v1156_v31 = vmul.f32 %v1147_v1, %v1137_v13  ;;  %v1155_v44 = vmul.f32 %v1145_v14, %v1133_v30 }
 0x293   : > { %v1468_v23 = vclamps-f32 %v1064_v51, 1000000.0  ;;  %v1158_v16 = vadd.f32 %v1154_v53, %v1126_v40  ;;  %v1160_v61 = vadd.f32 %v1156_v31, %v1128_v8 }
 0x294   : > { %v1149_v45 = vpop.permute.xlu1 %1148  ;;  %v1194_v46 = vpop.permute.xlu0 (!%p1483_p8), %1193 }
 0x295   : > { %1472 = vst.msk [vmem:[%s2015_s17 + $0x68] sm:$0xff] %vm320_vm1, %v1468_v23  ;;  %v1475_v36 = vclamps-f32 %v1158_v16, 1000000.0  ;;  %v1127_v32 = vmul.f32 %v1468_v23, %v2432_v17  ;;  %v1477_v43 = vclamps-f32 %v1160_v61, 1000000.0  ;;  %v1157_v63 = vmul.f32 %v1149_v45, %v1137_v13 }
 0x296   : > { %1182 = sbr.rel (%p1483_p8) target bundleno = 690 (0x2b2), region = 60 }
 0x297   : > { %1479 = vst.msk [vmem:[%s2015_s17 + $0x70] sm:$0xff] %vm320_vm1, %v1475_v36  ;;  %1175 = vst.msk [vmem:[#allocation2] sm:$0xff] %vm320_vm1, %v1475_v36  ;;  %v1159_v62 = vadd.f32 %v1155_v44, %v1127_v32  ;;  %v1161_v57 = vadd.f32 %v1157_v63, %v1129_v34  ;;  %v1201_v48 = vmul.f32 (!%p1483_p8), %v1477_v43, %v1194_v46 }
 0x298   : > { %1481 = vst.msk [vmem:[%s2015_s17 + $0xf0] sm:$0xff] %vm320_vm1, %v1477_v43  ;;  %1177 = vst.msk [vmem:[#allocation2 + $0x10] sm:$0xff] %vm320_vm1, %v1477_v43  ;;  %v1186_v17 = vpop.permute.xlu1 (!%p1483_p8), %1185  ;;  %v1198_v18 = vpop.permute.xlu0 (!%p1483_p8), %1197 }
 0x299   : > { %v1476_v12 = vclamps-f32 %v1159_v62, 1000000.0  ;;  %v1478_v2 = vclamps-f32 %v1161_v57, 1000000.0  ;;  %v1199_v47 = vmul.f32 (!%p1483_p8), %v1475_v36, %v1186_v17  ;;  %v1212_v37 = vsel (!%p1483_p8), %vm320_vm1, %v1201_v48, 0.0 }
 0x29b   : > { %1480 = vst.msk [vmem:[%s2015_s17 + $0x78] sm:$0xff] %vm320_vm1, %v1476_v12  ;;  %1176 = vst.msk [vmem:[#allocation2 + $0x8] sm:$0xff] %vm320_vm1, %v1476_v12  ;;  %v1202_v20 = vmul.f32 (!%p1483_p8), %v1478_v2, %v1198_v18  ;;  %v1203_v39 = vsel (!%p1483_p8), %vm320_vm1, %v1199_v47, 0.0 }
 0x29c   : > { %1482 = vst.msk [vmem:[%s2015_s17 + $0xf8] sm:$0xff] %vm320_vm1, %v1478_v2  ;;  %1178 = vst.msk [vmem:[#allocation2 + $0x18] sm:$0xff] %vm320_vm1, %v1478_v2  ;;  %v1190_v60 = vpop.permute.xlu1 (!%p1483_p8), %1189 }
 0x29d   : > { %v1200_v0 = vmul.f32 %v1476_v12, %v1190_v60  ;;  %v1213_v33 = vsel %vm320_vm1, %v1202_v20, 0.0 }
 0x29e   : > { %v1214_v50 = vadd.f32 %v1213_v33, %v1212_v37 }
 0x29f   : > { %v1204_v41 = vsel %vm320_vm1, %v1200_v0, 0.0 }
 0x2a0   : > { %v1205_v4 = vadd.f32 %v1204_v41, %v1203_v39  ;;  %v1215_v42 = vrot.slane %v1214_v50, 4 }
 0x2a2   : > { %v1206_v24 = vrot.slane %v1205_v4, 4  ;;  %v1216_v54 = vadd.f32 %v1215_v42, %v1214_v50 }
 0x2a4   : > { %v1207_v10 = vadd.f32 %v1206_v24, %v1205_v4  ;;  %v1217_v22 = vrot.slane %v1216_v54, 2 }
 0x2a6   : > { %v1208_v59 = vrot.slane %v1207_v10, 2  ;;  %v1218_v26 = vadd.f32 %v1217_v22, %v1216_v54 }
 0x2a8   : > { %v1209_v27 = vadd.f32 %v1208_v59, %v1207_v10  ;;  %v1219_v7 = vrot.slane %v1218_v26, 1 }
 0x2aa   : > { %v1210_v49 = vrot.slane %v1209_v27, 1  ;;  %v1220_v56 = vadd.f32 %v1219_v7, %v1218_v26 }
 0x2ac   : > { %v1211_v55 = vadd.f32 %v1210_v49, %v1209_v27  ;;  %v1239_v5 = vadd.f32 %v1235_v38, %v1220_v56 }
 0x2ae   : > { %v1238_v58 = vadd.f32 %v1233_v52, %v1211_v55  ;;  %v1242_v21 = vrot.slane %v1239_v5, 7 }
 0x2b0   : > { %v1243_v35 = vsel %vm1230_vm2, %v1242_v21, %v1238_v58 }
 0x2b1   : > { %1246 = vst.msk [vmem:[#allocation9] sm:$0x3] %vm1245_vm3, %v1243_v35 }
 0x2b2 PF: > { %s1782_s14 = smov [#allocation9]   ;;  %p2597_p2 = scmp.eq.s32.totalorder %s1846_s25, 1 }
 0x2b3   : > { %s1259_s15 = sshll.u32 %s1782_s14, 4  ;;  %s1260_s15 = int_to_ptr.vmem [resolvable:$true] %s1259_s15 }
 0x2b4   : > { %s1699_s19 = scalar_lea.vmem %s1260_s15, 32  ;;  %p1706_p0 = scmp.lt.s32.totalorder %s1260_s15, %s1260_s15 }
 0x2b5   : > { %p1700_p9 = scmp.ne.s32.totalorder %s1260_s15, %s1699_s19  ;;  %p1707_p5 = scmp.lt.s32.totalorder %s1699_s19, %s1699_s19 }
 0x2b7   : > { %p1701_p4 = pnand %p1700_p9, %p2597_p2  ;;  %p1708_p11 = por %p1707_p5, %p1706_p0 }
 0x2b9   : > { %p1702_p7 = pneg %p1701_p4 }
 0x2bb   : > { %p1709_p12 = pnand %p1708_p11, %p1702_p7 }
 0x2bd   : > { %1712 = shalt.err (!%p1709_p12)
}
 0x2be   : > { %s1713_s13 = scalar_lea.hbm %s2571_s5, 32  ;;  %p2598_p6 = pmov %p2597_p2 }
 0x2bf   : > { %p1714_p1 = scmp.ne.s32.totalorder %s2571_s5, %s1713_s13  ;;  %p1719_p3 = scmp.lt.u32.totalorder %s1713_s13, %s2571_s5 }
 0x2c1   : > { %p1715_p10 = pnand %p1714_p1, %p2598_p6 }
 0x2c3   : > { %p1716_p13 = pneg %p1715_p10 }
 0x2c5   : > { %p1721_p8 = pnand %p1719_p3, %p1716_p13 }
 0x2c7   : > { %1724 = shalt.err (!%p1721_p8)
}
 0x2c8   : > { %p2599_p9 = pmov %p2597_p2  ;;  %s1248_s30 = scalar_lea.sflag [#allocation11], %s2000_s29 }
 0x2ca   : > { %1531 = dma.vmem_to_hbm [thread:$0]  (%p2599_p9), %s1260_s15, 32, %s2571_s5, [#allocation5]  }
 0x2cb   : > { %s1494_s28 = sshll.u32 %s1846_s25, 11  ;;  %s1289_s14 = sshll.u32 %s2015_s17, 4  ;;  %s1290_s14 = int_to_ptr.vmem [resolvable:$true] %s1289_s14 }
 0x2cc   : > { %s1272_s12 = scalar_lea.hbm %s2572_s6, %s1494_s28  ;;  %s1783_s13 = smov 2048  }
 0x2cd   : > { %p2600_p2 = scmp.ne.s32.totalorder %s2583_s9, 0  ;;  %s1784_s29 = smov 4096  }
 0x2ce   : > { %s1785_s15 = smov 16   ;;  %s1786_s26 = smov 128  }
 0x2cf   : > { %1532 = sst [smem:[#allocation13]] (%p2600_p2), %s1783_s13  ;;  %s1787_s17 = smov 8  }
 0x2d0   : > { %1533 = sst [smem:[#allocation13 + $0x1]] (%p2600_p2), %s1784_s29  ;;  %s1788_s11 = smov [#allocation12]  }
 0x2d1   : > { %1534 = sst [smem:[#allocation13 + $0x2]] (%p2600_p2), %s1785_s15  ;;  %s1789_s8 = smov 0  }
 0x2d2   : > { %1535 = sst [smem:[#allocation13 + $0x3]] (%p2600_p2), %s1786_s26  ;;  %p2601_p4 = pmov %p2598_p6 }
 0x2d3   : > { %1536 = sst [smem:[#allocation13 + $0x4]] (%p2600_p2), %s1786_s26 }
 0x2d4   : > { %1537 = sst [smem:[#allocation13 + $0x5]] (%p2600_p2), %s1787_s17 }
 0x2d5   : > { %1538 = dma.general (%p2600_p2), %s1290_s14, 4096, %s1272_s12, %s1248_s30, %s1788_s11, [#allocation13], %s1789_s8, 0  }
 0x2d6   : > { %1750 = dma.done.wait (%p2601_p4), [#allocation5], 32   ;;  %p2602_p7 = pmov %p2601_p4 }
 0x2d8   : > { %1752 = vsyncadd (%p2602_p7), [#allocation5], 4294967264 }
 0x2d9 PF: > { %s1321_s20 = sand.u32 1, %s1759_s21   ;;  %p2603_p0 = scmp.ne.s32.totalorder %s2584_s10, 0 }
 0x2da   : > { %p2604_p5 = scmp.ge.s32.totalorder %s1771_s24, 2  ;;  %s1322_s7 = scalar_lea.sflag [#allocation11], %s1321_s20 }
 0x2dc   : > { %p1554_p11 = pnand %p2604_p5, %p2603_p0 }
 0x2de   : > { %1754 = dma.done.wait (!%p1554_p11), %s1322_s7, 4096  }
 0x2df   : > { %1756 = vsyncadd (!%p1554_p11), %s1322_s7, 4294963200  ;;  %s2605_s9 = sld [smem:[#allocation18_spill]]  ;;  %p22_p12 = scmp.ge.s32.totalorder %s1850_s27, 4  }
 0x2e0   : > { %s2606_s21 = smov %s1763_s22  ;;  %s2607_s22 = smov %s1767_s23 }
 0x2e1   : > { %s2609_s24 = smov %s1850_s27  ;;  %24 = sbr.rel (!%p22_p12) target bundleno = 7 (0x7), region = 122 }
 0x2e5   : > { %s2608_s23 = smov %s2605_s9 }
 0x2e8   :  { %1327 = vsyncpa [#allocation4], 1 }
 0x2e9   :  { %1329 = vsyncpa [#allocation4 + $0x1], 1 }
 0x2ea   :  { %1330 = vsyncpa [#allocation7], 1 }
 0x2eb   :  { %1331 = vsyncpa [#allocation5], 1 }
 0x2ec   :  { %1333 = vsyncpa [#allocation5 + $0x1], 1 }
 0x2ed   :  { %1334 = vsyncpa [#allocation11], 1 }
 0x2ee   :  { %1336 = vsyncpa [#allocation11 + $0x1], 1 }

</bundles_post_ra>
